<compile_context>
chip_gen: v6e
topology: v6e:2x2x1
jax: 0.10.0
libtpu: 0.0.40
codegen_flags: <defaults>
</compile_context>

<pallas_src>
import jax
import jax.numpy as jnp
from jax import lax
from jax.experimental import pallas as pl
from jax.experimental.pallas import tpu as pltpu

# ----------------------- small, module-consistent configuration -------------------------
NUM_AGENT_ACTIONS = 5
MAX_DEMO_LENGTH = 8           # T
BATCH = 2                     # programs
DEMOS_PER_PROGRAM = 2         # demos per program
PERC_SIZE = 16                # perception vector size (perceptions=True path)
HIDDEN = 32                   # latent size == GRU hidden size (gru_hidden = z.unsqueeze(0))
STATE_ENC = 32                # state encoder output size
ACTION_ENC = 16               # action embedding size
GRU_IN = HIDDEN + STATE_ENC + ACTION_ENC

TILE_N_MAX = 256              # sublane tile over the flattened batch axis (multiple of 8)
NEG_MASK = -1e30              # large-but-finite termination mask (argmax-safe; |logits| << 1e30)
NEG_MAX = float(jnp.finfo(jnp.float32).max)

# Flip on v6e/v7x to run the off-chain (pre-pass / MLP-head) matmuls with bf16 MXU operands
# (f32 accumulate). Kept False by default so the 2e-4 reference check and exact argmax hold.
USE_BF16_OFFCHAIN = False


def _sigmoid(x):
    # exact sigmoid via tanh: keeps the transcendental on the EUP slot, no VPU divide.
    return 0.5 * (jnp.tanh(0.5 * x) + 1.0)


def _mm(a, b):
    # off-chain matmul helper: optionally bf16 operands, always f32 accumulation.
    if USE_BF16_OFFCHAIN:
        a = a.astype(jnp.bfloat16)
        b = b.astype(jnp.bfloat16)
    return jnp.dot(a, b, preferred_element_type=jnp.float32)


def _round_up(x, m):
    return ((x + m - 1) // m) * m


# --------------------------------------- kernel -----------------------------------------
def decoder_kernel(z_ref, s_ref, aoh_ref,
                   ws_ref, bs_ref, emb_ref,
                   wih_ref, bih_ref, whh_ref, bhh_ref,
                   wm1_ref, bm1_ref, wm2_ref, bm2_ref,
                   act_out_ref, logits_out_ref,
                   gi_rz_scr, gi_n_scr, hs_scr):
    n, H = z_ref.shape                        # (tile_n, HIDDEN)
    T1, _, P = s_ref.shape                    # decode steps, tile rows, perception size
    A = aoh_ref.shape[-1]
    S_ENC = ws_ref.shape[1]
    f32 = jnp.float32

    z = z_ref[...]                            # (n, H)  repeated latent == GRU h0
    aoh = aoh_ref[...]                        # (T1, n, A) teacher-forced one-hot actions
    ws, bs = ws_ref[...], bs_ref[...]
    emb = emb_ref[...]
    wih, bih = wih_ref[...], bih_ref[...]
    whh, bhh = whh_ref[...], bhh_ref[...]
    wm1, bm1 = wm1_ref[...], bm1_ref[...]
    wm2, bm2 = wm2_ref[...], bm2_ref[...]

    # ------------------ one-time weight prep (off the serial chain) ---------------------
    w_in_z = wih[:H, :]                       # (H, 3H)       latent rows of W_ih^T
    w_in_s = wih[H:H + S_ENC, :]              # (S_ENC, 3H)
    w_in_a = wih[H + S_ENC:, :]               # (A_ENC, 3H)
    a_table = _mm(emb, w_in_a)                # action embedding folded into W_ih: (A, 3H)
    rhs_cat = jnp.concatenate([w_in_s, a_table], axis=0)          # (S_ENC + A, 3H)
    # r/z hidden biases sit outside the r* product -> fold them into the input-gate base
    lane3h = lax.broadcasted_iota(jnp.int32, (1, 3 * H), 1)
    bhh_rz = jnp.where(lane3h < 2 * H, bhh, 0.0)
    gi_base = _mm(z, w_in_z) + bih + bhh_rz                       # (n, 3H), same every step
    bhh_n_b = jnp.broadcast_to(bhh[:, 2 * H:], (n, H))            # hoisted broadcast

    # -------- batched h-independent pre-pass: 2 fat matmuls over all T1 steps -----------
    s_flat = s_ref[...].reshape(T1 * n, P)                        # t-major state slab
    enc_all = jnp.maximum(_mm(s_flat, ws) + bs, 0.0)              # (T1*n, S_ENC)
    lhs_cat = jnp.concatenate([enc_all, aoh.reshape(T1 * n, A)], axis=-1)  # (T1*n, S_ENC+A)
    gi3 = _mm(lhs_cat, rhs_cat).reshape(T1, n, 3 * H)             # all steps' gate inputs
    # split per gate group once (off-chain) so the recurrence never lane-rotates gi
    gi_rz_scr[...] = gi3[:, :, :2 * H] + gi_base[None, :, :2 * H]
    gi_n_scr[...] = gi3[:, :, 2 * H:] + gi_base[None, :, 2 * H:]

    # ----- serial GRU recurrence: one whh dot + fused gate elementwise per step ---------
    h = z
    for t in range(T1):
        gh = jnp.dot(h, whh, preferred_element_type=f32)          # (n, 3H), single MXU push
        rz = _sigmoid(gi_rz_scr[t] + gh[:, :2 * H])               # fused r/z sigmoid (2H lanes)
        r = rz[:, :H]
        zt = rz[:, H:2 * H]
        nt = jnp.tanh(gi_n_scr[t] + r * (gh[:, 2 * H:] + bhh_n_b))
        h = (1.0 - zt) * nt + zt * h
        hs_scr[t] = h

    # ---------- batched MLP head + masked argmax; lane-dense output packing -------------
    hs_flat = hs_scr[...].reshape(T1 * n, H)
    hid = jnp.tanh(_mm(hs_flat, wm1) + bm1)
    logits_flat = _mm(hid, wm2) + bm2                             # (T1*n, A)

    # teacher-forced termination flags: term[t] = OR_{1<=j<=t} (a_h[:, j] == A-1)
    terms = []
    run = jnp.zeros((n, 1), f32)
    for t in range(T1):
        terms.append(run)
        if t + 1 < T1:
            run = jnp.maximum(run, aoh[t + 1, :, A - 1:A])
    term_flat = jnp.concatenate(terms, axis=0)                    # (T1*n, 1)

    mask_row = jnp.where(lax.broadcasted_iota(jnp.int32, (1, A), 1) == A - 1,
                         0.0, NEG_MASK)                           # (1, A)
    masked = logits_flat + term_flat * mask_row                   # argmax-safe masking
    idx_f = lax.broadcasted_iota(jnp.int32, (T1 * n, A), 1).astype(f32)
    m = jnp.max(masked, axis=-1, keepdims=True)
    pred_flat = jnp.min(jnp.where(masked == m, idx_f, float(A)),
                        axis=-1, keepdims=True).astype(jnp.int32)  # (T1*n, 1)

    logits3 = logits_flat.reshape(T1, n, A)
    preds3 = pred_flat.reshape(T1, n, 1)
    # lane-dense outputs: (n, T1*A) and (n, T1) -> wide stores, wrapper only reshapes
    logits_out_ref[...] = jnp.concatenate([logits3[t] for t in range(T1)], axis=-1)
    act_out_ref[...] = jnp.concatenate([preds3[t] for t in range(T1)], axis=-1)


# --------------------------------------- wrapper ----------------------------------------
def _rep_spec(shape):
    rank = len(shape)
    return pl.BlockSpec(shape, lambda i, _r=rank: (0,) * _r)


@jax.jit
def trajectory_sequence_decoder_forward(latent, s_h, a_h, a_h_mask, params):
    """latent: (B, H); s_h: (B, D, T, perc_size); a_h: (B, D, T) int."""
    del a_h_mask                                   # unused by the reference forward
    B, D, T, P = s_h.shape
    N = B * D
    H = latent.shape[1]
    A = NUM_AGENT_ACTIONS
    T1 = T - 1

    # tile over the flattened batch: as fat as possible (MXU fill, fewer grid steps),
    # capped at TILE_N_MAX so per-tile VMEM (inputs + scratch) stays ~1-2 MiB even on v7x.
    tile_n = min(TILE_N_MAX, _round_up(N, 8))
    n_pad = _round_up(N, tile_n)
    pad = n_pad - N
    n_tiles = n_pad // tile_n

    z_rep = jnp.repeat(latent[:, None, :], D, axis=1).reshape(N, H).astype(jnp.float32)
    states = s_h.reshape(N, T, P).astype(jnp.float32)
    states_tm = jnp.transpose(states[:, :T1], (1, 0, 2))            # (T1, N, P) t-major
    acts = a_h.reshape(N, T).astype(jnp.int32)
    acts_in = acts[:, :T1].at[:, 0].set(A - 1)                      # <SOS> at step 0
    aoh = (acts_in[..., None] == jnp.arange(A)[None, None, :]).astype(jnp.float32)
    aoh_tm = jnp.transpose(aoh, (1, 0, 2))                          # (T1, N, A) t-major

    z_rep = jnp.pad(z_rep, ((0, pad), (0, 0)))
    states_tm = jnp.pad(states_tm, ((0, 0), (0, pad), (0, 0)))
    aoh_tm = jnp.pad(aoh_tm, ((0, 0), (0, pad), (0, 0)))

    grid_spec = pltpu.PrefetchScalarGridSpec(
        num_scalar_prefetch=0,
        grid=(n_tiles,),
        in_specs=[pl.BlockSpec((tile_n, H), lambda i: (i, 0)),
                  pl.BlockSpec((T1, tile_n, P), lambda i: (0, i, 0)),
                  pl.BlockSpec((T1, tile_n, A), lambda i: (0, i, 0)),
                  _rep_spec(params["ws"].shape), _rep_spec(params["bs"].shape),
                  _rep_spec(params["emb"].shape),
                  _rep_spec(params["wih"].shape), _rep_spec(params["bih"].shape),
                  _rep_spec(params["whh"].shape), _rep_spec(params["bhh"].shape),
                  _rep_spec(params["wm1"].shape), _rep_spec(params["bm1"].shape),
                  _rep_spec(params["wm2"].shape), _rep_spec(params["bm2"].shape)],
        out_specs=(pl.BlockSpec((tile_n, T1), lambda i: (i, 0)),
                   pl.BlockSpec((tile_n, T1 * A), lambda i: (i, 0))),
        scratch_shapes=[pltpu.VMEM((T1, tile_n, 2 * H), jnp.float32),   # gi_rz
                        pltpu.VMEM((T1, tile_n, H), jnp.float32),       # gi_n
                        pltpu.VMEM((T1, tile_n, H), jnp.float32)],      # hs
    )

    preds_out, logits_out = pl.pallas_call(
        decoder_kernel,
        grid_spec=grid_spec,
        out_shape=(jax.ShapeDtypeStruct((n_pad, T1), jnp.int32),
                   jax.ShapeDtypeStruct((n_pad, T1 * A), jnp.float32)),
        compiler_params=pltpu.CompilerParams(dimension_semantics=("parallel",)),
    )(z_rep, states_tm, aoh_tm,
      params["ws"], params["bs"], params["emb"],
      params["wih"], params["bih"], params["whh"], params["bhh"],
      params["wm1"], params["bm1"], params["wm2"], params["bm2"])

    pred_a_h = preds_out[:N]                                        # (N, T-1)
    pred_a_h_logits = logits_out[:N].reshape(N, T1, A)              # (N, T-1, A)
    pred_a_h_masks = pred_a_h != (A - 1)
    return pred_a_h, pred_a_h_logits, pred_a_h_masks


# --------------------------------- deterministic params ---------------------------------
def init_params(key):
    ks = jax.random.split(key, 11)

    def w(k, shape, scale=0.1):
        return (scale * jax.random.normal(k, shape)).astype(jnp.float32)

    return {
        "ws": w(ks[0], (PERC_SIZE, STATE_ENC)),            # state encoder Linear
        "bs": w(ks[1], (1, STATE_ENC)),
        "emb": w(ks[2], (NUM_AGENT_ACTIONS, ACTION_ENC)),  # action embedding table
        "wih": w(ks[3], (GRU_IN, 3 * HIDDEN)),             # GRU W_ih^T, gate order [r,z,n]
        "bih": w(ks[4], (1, 3 * HIDDEN)),
        "whh": w(ks[5], (HIDDEN, 3 * HIDDEN)),             # GRU W_hh^T
        "bhh": w(ks[6], (1, 3 * HIDDEN)),
        "wm1": w(ks[7], (HIDDEN, HIDDEN)),                 # MLP head
        "bm1": w(ks[8], (1, HIDDEN)),
        "wm2": w(ks[9], (HIDDEN, NUM_AGENT_ACTIONS)),
        "bm2": w(ks[10], (1, NUM_AGENT_ACTIONS)),
    }


# ------------------------------- pure-JAX reference (check) -----------------------------
def reference_forward(latent, s_h, a_h, params):
    B, D, T, P = s_h.shape
    N = B * D
    H = latent.shape[1]
    A = NUM_AGENT_ACTIONS
    z = jnp.repeat(latent[:, None, :], D, axis=1).reshape(N, H)
    states = s_h.reshape(N, T, P)
    acts = a_h.reshape(N, T)
    ws, bs, emb = params["ws"], params["bs"], params["emb"]
    wih, bih, whh, bhh = params["wih"], params["bih"], params["whh"], params["bhh"]
    wm1, bm1, wm2, bm2 = params["wm1"], params["bm1"], params["wm2"], params["bm2"]

    mask_row = jnp.where(jnp.arange(A) == A - 1, 0.0, -NEG_MAX)[None, :]
    h = z
    term = jnp.zeros((N, 1), jnp.float32)
    cur_state = states[:, 0]
    cur_action = jnp.full((N,), A - 1, jnp.int32)
    preds, logits_all = [], []
    for i in range(1, T):
        enc_s = jnp.maximum(cur_state @ ws + bs, 0.0)
        enc_a = emb[cur_action]
        x = jnp.concatenate([z, enc_s, enc_a], axis=-1)
        gi = x @ wih + bih
        gh = h @ whh + bhh
        r = jax.nn.sigmoid(gi[:, :H] + gh[:, :H])
        zt = jax.nn.sigmoid(gi[:, H:2 * H] + gh[:, H:2 * H])
        nt = jnp.tanh(gi[:, 2 * H:] + r * gh[:, 2 * H:])
        h = (1.0 - zt) * nt + zt * h
        logits = jnp.tanh(h @ wm1 + bm1) @ wm2 + bm2
        masked = logits + term * mask_row
        pred = jnp.argmax(jax.nn.log_softmax(masked, axis=-1), axis=-1).astype(jnp.int32)
        preds.append(pred)
        logits_all.append(logits)
        cur_state = states[:, i]
        cur_action = acts[:, i].astype(jnp.int32)
        term = jnp.maximum(term, (cur_action == A - 1)[:, None].astype(jnp.float32))
    pred_a_h = jnp.stack(preds, axis=1)
    pred_logits = jnp.stack(logits_all, axis=1)
    return pred_a_h, pred_logits, pred_a_h != A - 1


# ------------------------------------------ main ----------------------------------------
if __name__ == "__main__":
    key = jax.random.PRNGKey(0)
    k_lat, k_s, k_a, k_p = jax.random.split(key, 4)

    latent = jax.random.normal(k_lat, (BATCH, HIDDEN), jnp.float32)
    s_h = jax.random.normal(
        k_s, (BATCH, DEMOS_PER_PROGRAM, MAX_DEMO_LENGTH, PERC_SIZE), jnp.float32)
    a_h = jax.random.randint(
        k_a, (BATCH, DEMOS_PER_PROGRAM, MAX_DEMO_LENGTH), 0, NUM_AGENT_ACTIONS)
    a_h_mask = jnp.ones((BATCH, DEMOS_PER_PROGRAM, MAX_DEMO_LENGTH), jnp.bool_)
    params = init_params(k_p)

    pred_a, pred_logits, pred_mask = trajectory_sequence_decoder_forward(
        latent, s_h, a_h, a_h_mask, params)
    jax.block_until_ready((pred_a, pred_logits, pred_mask))

    ref_a, ref_logits, ref_mask = reference_forward(latent, s_h, a_h, params)

    N = BATCH * DEMOS_PER_PROGRAM
    assert pred_a.shape == (N, MAX_DEMO_LENGTH - 1)
    assert pred_logits.shape == (N, MAX_DEMO_LENGTH - 1, NUM_AGENT_ACTIONS)
    assert pred_mask.shape == (N, MAX_DEMO_LENGTH - 1)
    assert jnp.allclose(pred_logits, ref_logits, atol=2e-4, rtol=2e-4)
    assert jnp.array_equal(pred_a, ref_a)
    assert jnp.array_equal(pred_mask, ref_mask)

    print("KERNEL_OK")
</pallas_src>

<mosaic_0001>
module attributes {stable_mosaic.version = 11 : i64} {
  func.func @decoder_kernel(%arg0: i32, %arg1: memref<8x32xf32, #tpu.memory_space<vmem>>, %arg2: memref<7x8x16xf32, #tpu.memory_space<vmem>>, %arg3: memref<7x8x5xf32, #tpu.memory_space<vmem>>, %arg4: memref<16x32xf32, #tpu.memory_space<vmem>>, %arg5: memref<1x32xf32, #tpu.memory_space<vmem>>, %arg6: memref<5x16xf32, #tpu.memory_space<vmem>>, %arg7: memref<80x96xf32, #tpu.memory_space<vmem>>, %arg8: memref<1x96xf32, #tpu.memory_space<vmem>>, %arg9: memref<32x96xf32, #tpu.memory_space<vmem>>, %arg10: memref<1x96xf32, #tpu.memory_space<vmem>>, %arg11: memref<32x32xf32, #tpu.memory_space<vmem>>, %arg12: memref<1x32xf32, #tpu.memory_space<vmem>>, %arg13: memref<32x5xf32, #tpu.memory_space<vmem>>, %arg14: memref<1x5xf32, #tpu.memory_space<vmem>>, %arg15: memref<8x7xi32, #tpu.memory_space<vmem>>, %arg16: memref<8x35xf32, #tpu.memory_space<vmem>>, %arg17: memref<7x8x64xf32, #tpu.memory_space<vmem>>, %arg18: memref<7x8x32xf32, #tpu.memory_space<vmem>>, %arg19: memref<7x8x32xf32, #tpu.memory_space<vmem>>) attributes {dimension_semantics = [#tpu.dimension_semantics<parallel>], iteration_bounds = array<i64: 1>, scalar_prefetch = 0 : i64, scratch_operands = 3 : i64, tpu.core_type = #tpu.core_type<tc>, window_params = [{transform_indices = @transform_0, window_bounds = array<i64: 8, 32>}, {transform_indices = @transform_1, window_bounds = array<i64: 7, 8, 16>}, {transform_indices = @transform_2, window_bounds = array<i64: 7, 8, 5>}, {pipeline_mode = #tpu.pipeline_mode<synchronous>, transform_indices = @transform_3, window_bounds = array<i64: 16, 32>}, {pipeline_mode = #tpu.pipeline_mode<synchronous>, transform_indices = @transform_4, window_bounds = array<i64: 1, 32>}, {pipeline_mode = #tpu.pipeline_mode<synchronous>, transform_indices = @transform_5, window_bounds = array<i64: 5, 16>}, {pipeline_mode = #tpu.pipeline_mode<synchronous>, transform_indices = @transform_6, window_bounds = array<i64: 80, 96>}, {pipeline_mode = #tpu.pipeline_mode<synchronous>, transform_indices = @transform_7, window_bounds = array<i64: 1, 96>}, {pipeline_mode = #tpu.pipeline_mode<synchronous>, transform_indices = @transform_8, window_bounds = array<i64: 32, 96>}, {pipeline_mode = #tpu.pipeline_mode<synchronous>, transform_indices = @transform_9, window_bounds = array<i64: 1, 96>}, {pipeline_mode = #tpu.pipeline_mode<synchronous>, transform_indices = @transform_10, window_bounds = array<i64: 32, 32>}, {pipeline_mode = #tpu.pipeline_mode<synchronous>, transform_indices = @transform_11, window_bounds = array<i64: 1, 32>}, {pipeline_mode = #tpu.pipeline_mode<synchronous>, transform_indices = @transform_12, window_bounds = array<i64: 32, 5>}, {pipeline_mode = #tpu.pipeline_mode<synchronous>, transform_indices = @transform_13, window_bounds = array<i64: 1, 5>}, {transform_indices = @transform_14, window_bounds = array<i64: 8, 7>}, {transform_indices = @transform_15, window_bounds = array<i64: 8, 35>}]} {
    %c0 = arith.constant 0 : index
    %c0_0 = arith.constant 0 : index
    %0 = vector.load %arg1[%c0, %c0_0] : memref<8x32xf32, #tpu.memory_space<vmem>>, vector<8x32xf32>
    %c0_1 = arith.constant 0 : index
    %c0_2 = arith.constant 0 : index
    %c0_3 = arith.constant 0 : index
    %1 = vector.load %arg3[%c0_1, %c0_2, %c0_3] : memref<7x8x5xf32, #tpu.memory_space<vmem>>, vector<7x8x5xf32>
    %c0_4 = arith.constant 0 : index
    %c0_5 = arith.constant 0 : index
    %2 = vector.load %arg4[%c0_4, %c0_5] : memref<16x32xf32, #tpu.memory_space<vmem>>, vector<16x32xf32>
    %c0_6 = arith.constant 0 : index
    %c0_7 = arith.constant 0 : index
    %3 = vector.load %arg5[%c0_6, %c0_7] : memref<1x32xf32, #tpu.memory_space<vmem>>, vector<1x32xf32>
    %c0_8 = arith.constant 0 : index
    %c0_9 = arith.constant 0 : index
    %4 = vector.load %arg6[%c0_8, %c0_9] : memref<5x16xf32, #tpu.memory_space<vmem>>, vector<5x16xf32>
    %c0_10 = arith.constant 0 : index
    %c0_11 = arith.constant 0 : index
    %5 = vector.load %arg7[%c0_10, %c0_11] : memref<80x96xf32, #tpu.memory_space<vmem>>, vector<80x96xf32>
    %c0_12 = arith.constant 0 : index
    %c0_13 = arith.constant 0 : index
    %6 = vector.load %arg8[%c0_12, %c0_13] : memref<1x96xf32, #tpu.memory_space<vmem>>, vector<1x96xf32>
    %c0_14 = arith.constant 0 : index
    %c0_15 = arith.constant 0 : index
    %7 = vector.load %arg9[%c0_14, %c0_15] : memref<32x96xf32, #tpu.memory_space<vmem>>, vector<32x96xf32>
    %c0_16 = arith.constant 0 : index
    %c0_17 = arith.constant 0 : index
    %8 = vector.load %arg10[%c0_16, %c0_17] : memref<1x96xf32, #tpu.memory_space<vmem>>, vector<1x96xf32>
    %c0_18 = arith.constant 0 : index
    %c0_19 = arith.constant 0 : index
    %9 = vector.load %arg11[%c0_18, %c0_19] : memref<32x32xf32, #tpu.memory_space<vmem>>, vector<32x32xf32>
    %c0_20 = arith.constant 0 : index
    %c0_21 = arith.constant 0 : index
    %10 = vector.load %arg12[%c0_20, %c0_21] : memref<1x32xf32, #tpu.memory_space<vmem>>, vector<1x32xf32>
    %c0_22 = arith.constant 0 : index
    %c0_23 = arith.constant 0 : index
    %11 = vector.load %arg13[%c0_22, %c0_23] : memref<32x5xf32, #tpu.memory_space<vmem>>, vector<32x5xf32>
    %c0_24 = arith.constant 0 : index
    %c0_25 = arith.constant 0 : index
    %12 = vector.load %arg14[%c0_24, %c0_25] : memref<1x5xf32, #tpu.memory_space<vmem>>, vector<1x5xf32>
    %13 = vector.extract_strided_slice %5 {offsets = [0, 0], sizes = [32, 96], strides = [1, 1]} : vector<80x96xf32> to vector<32x96xf32>
    %14 = vector.extract_strided_slice %5 {offsets = [32, 0], sizes = [32, 96], strides = [1, 1]} : vector<80x96xf32> to vector<32x96xf32>
    %15 = vector.extract_strided_slice %5 {offsets = [64, 0], sizes = [16, 96], strides = [1, 1]} : vector<80x96xf32> to vector<16x96xf32>
    %cst = arith.constant dense<0.000000e+00> : vector<5x96xf32>
    %16 = tpu.matmul %4, %15, %cst {dimension_numbers = #tpu.dot_dimension_numbers<[1], [0], [0], [1], [0, 0, 1, 1], [], []>} : vector<5x16xf32>, vector<16x96xf32>, vector<5x96xf32> -> vector<5x96xf32>
    %17 = tpu.concatenate %14, %16 in 0 : vector<32x96xf32>, vector<5x96xf32> -> vector<37x96xf32>
    %18 = tpu.iota {dimensions = array<i32: 1>} : vector<1x96xi32>
    %c64_i32 = arith.constant 64 : i32
    %19 = vector.broadcast %c64_i32 : i32 to vector<1x96xi32>
    %20 = arith.cmpi slt, %18, %19 : vector<1x96xi32>
    %cst_26 = arith.constant 0.000000e+00 : f32
    %21 = vector.broadcast %cst_26 : f32 to vector<1x96xf32>
    %22 = arith.select %20, %8, %21 : vector<1x96xi1>, vector<1x96xf32>
    %cst_27 = arith.constant dense<0.000000e+00> : vector<8x96xf32>
    %23 = tpu.matmul %0, %13, %cst_27 {dimension_numbers = #tpu.dot_dimension_numbers<[1], [0], [0], [1], [0, 0, 1, 1], [], []>} : vector<8x32xf32>, vector<32x96xf32>, vector<8x96xf32> -> vector<8x96xf32>
    %24 = vector.broadcast %6 : vector<1x96xf32> to vector<8x96xf32>
    %25 = arith.addf %23, %24 : vector<8x96xf32>
    %26 = vector.broadcast %22 : vector<1x96xf32> to vector<8x96xf32>
    %27 = arith.addf %25, %26 : vector<8x96xf32>
    %28 = vector.extract_strided_slice %8 {offsets = [0, 64], sizes = [1, 32], strides = [1, 1]} : vector<1x96xf32> to vector<1x32xf32>
    %29 = vector.shape_cast %28 : vector<1x32xf32> to vector<1x32xf32>
    %30 = vector.broadcast %29 : vector<1x32xf32> to vector<8x32xf32>
    %c0_28 = arith.constant 0 : index
    %c0_29 = arith.constant 0 : index
    %c0_30 = arith.constant 0 : index
    %31 = vector.load %arg2[%c0_28, %c0_29, %c0_30] : memref<7x8x16xf32, #tpu.memory_space<vmem>>, vector<7x8x16xf32>
    %32 = vector.shape_cast %31 : vector<7x8x16xf32> to vector<56x16xf32>
    %cst_31 = arith.constant dense<0.000000e+00> : vector<56x32xf32>
    %33 = tpu.matmul %32, %2, %cst_31 {dimension_numbers = #tpu.dot_dimension_numbers<[1], [0], [0], [1], [0, 0, 1, 1], [], []>} : vector<56x16xf32>, vector<16x32xf32>, vector<56x32xf32> -> vector<56x32xf32>
    %34 = vector.broadcast %3 : vector<1x32xf32> to vector<56x32xf32>
    %35 = arith.addf %33, %34 : vector<56x32xf32>
    %cst_32 = arith.constant 0.000000e+00 : f32
    %36 = vector.broadcast %cst_32 : f32 to vector<56x32xf32>
    %37 = arith.maximumf %35, %36 : vector<56x32xf32>
    %38 = vector.shape_cast %1 : vector<7x8x5xf32> to vector<56x5xf32>
    %39 = tpu.concatenate %37, %38 in 1 : vector<56x32xf32>, vector<56x5xf32> -> vector<56x37xf32>
    %cst_33 = arith.constant dense<0.000000e+00> : vector<56x96xf32>
    %40 = tpu.matmul %39, %17, %cst_33 {dimension_numbers = #tpu.dot_dimension_numbers<[1], [0], [0], [1], [0, 0, 1, 1], [], []>} : vector<56x37xf32>, vector<37x96xf32>, vector<56x96xf32> -> vector<56x96xf32>
    %41 = vector.shape_cast %40 : vector<56x96xf32> to vector<7x8x96xf32>
    %42 = vector.extract_strided_slice %41 {offsets = [0, 0, 0], sizes = [7, 8, 64], strides = [1, 1, 1]} : vector<7x8x96xf32> to vector<7x8x64xf32>
    %43 = vector.extract_strided_slice %27 {offsets = [0, 0], sizes = [8, 64], strides = [1, 1]} : vector<8x96xf32> to vector<8x64xf32>
    %44 = vector.shape_cast %43 : vector<8x64xf32> to vector<1x8x64xf32>
    %45 = vector.broadcast %44 : vector<1x8x64xf32> to vector<7x8x64xf32>
    %46 = arith.addf %42, %45 : vector<7x8x64xf32>
    %c0_34 = arith.constant 0 : index
    %c0_35 = arith.constant 0 : index
    %c0_36 = arith.constant 0 : index
    %47 = vector.load %arg17[%c0_34, %c0_35, %c0_36] : memref<7x8x64xf32, #tpu.memory_space<vmem>>, vector<7x8x64xf32>
    tpu.vector_store %arg17[%c0_34, %c0_35, %c0_36], %46 {strides = array<i32>} : memref<7x8x64xf32, #tpu.memory_space<vmem>>, vector<7x8x64xf32>,
    %48 = vector.extract_strided_slice %41 {offsets = [0, 0, 64], sizes = [7, 8, 32], strides = [1, 1, 1]} : vector<7x8x96xf32> to vector<7x8x32xf32>
    %49 = vector.extract_strided_slice %27 {offsets = [0, 64], sizes = [8, 32], strides = [1, 1]} : vector<8x96xf32> to vector<8x32xf32>
    %50 = vector.shape_cast %49 : vector<8x32xf32> to vector<1x8x32xf32>
    %51 = vector.broadcast %50 : vector<1x8x32xf32> to vector<7x8x32xf32>
    %52 = arith.addf %48, %51 : vector<7x8x32xf32>
    %c0_37 = arith.constant 0 : index
    %c0_38 = arith.constant 0 : index
    %c0_39 = arith.constant 0 : index
    %53 = vector.load %arg18[%c0_37, %c0_38, %c0_39] : memref<7x8x32xf32, #tpu.memory_space<vmem>>, vector<7x8x32xf32>
    tpu.vector_store %arg18[%c0_37, %c0_38, %c0_39], %52 {strides = array<i32>} : memref<7x8x32xf32, #tpu.memory_space<vmem>>, vector<7x8x32xf32>,
    %cst_40 = arith.constant dense<0.000000e+00> : vector<8x96xf32>
    %54 = tpu.matmul %0, %7, %cst_40 {dimension_numbers = #tpu.dot_dimension_numbers<[1], [0], [0], [1], [0, 0, 1, 1], [], []>} : vector<8x32xf32>, vector<32x96xf32>, vector<8x96xf32> -> vector<8x96xf32>
    %c0_41 = arith.constant 0 : index
    %c0_42 = arith.constant 0 : index
    %c0_43 = arith.constant 0 : index
    %55 = vector.load %arg17[%c0_41, %c0_42, %c0_43] : memref<7x8x64xf32, #tpu.memory_space<vmem>>, vector<1x8x64xf32>
    %56 = vector.shape_cast %55 : vector<1x8x64xf32> to vector<8x64xf32>
    %57 = vector.extract_strided_slice %54 {offsets = [0, 0], sizes = [8, 64], strides = [1, 1]} : vector<8x96xf32> to vector<8x64xf32>
    %58 = arith.addf %56, %57 : vector<8x64xf32>
    %cst_44 = arith.constant 5.000000e-01 : f32
    %59 = vector.broadcast %cst_44 : f32 to vector<8x64xf32>
    %60 = arith.mulf %59, %58 : vector<8x64xf32>
    %61 = math.tanh %60 : vector<8x64xf32>
    %cst_45 = arith.constant 1.000000e+00 : f32
    %62 = vector.broadcast %cst_45 : f32 to vector<8x64xf32>
    %63 = arith.addf %61, %62 : vector<8x64xf32>
    %cst_46 = arith.constant 5.000000e-01 : f32
    %64 = vector.broadcast %cst_46 : f32 to vector<8x64xf32>
    %65 = arith.mulf %64, %63 : vector<8x64xf32>
    %66 = vector.extract_strided_slice %65 {offsets = [0, 0], sizes = [8, 32], strides = [1, 1]} : vector<8x64xf32> to vector<8x32xf32>
    %67 = vector.extract_strided_slice %65 {offsets = [0, 32], sizes = [8, 32], strides = [1, 1]} : vector<8x64xf32> to vector<8x32xf32>
    %c0_47 = arith.constant 0 : index
    %c0_48 = arith.constant 0 : index
    %c0_49 = arith.constant 0 : index
    %68 = vector.load %arg18[%c0_47, %c0_48, %c0_49] : memref<7x8x32xf32, #tpu.memory_space<vmem>>, vector<1x8x32xf32>
    %69 = vector.shape_cast %68 : vector<1x8x32xf32> to vector<8x32xf32>
    %70 = vector.extract_strided_slice %54 {offsets = [0, 64], sizes = [8, 32], strides = [1, 1]} : vector<8x96xf32> to vector<8x32xf32>
    %71 = arith.addf %70, %30 : vector<8x32xf32>
    %72 = arith.mulf %66, %71 : vector<8x32xf32>
    %73 = arith.addf %69, %72 : vector<8x32xf32>
    %74 = math.tanh %73 : vector<8x32xf32>
    %cst_50 = arith.constant 1.000000e+00 : f32
    %75 = vector.broadcast %cst_50 : f32 to vector<8x32xf32>
    %76 = arith.subf %75, %67 : vector<8x32xf32>
    %77 = arith.mulf %76, %74 : vector<8x32xf32>
    %78 = arith.mulf %67, %0 : vector<8x32xf32>
    %79 = arith.addf %77, %78 : vector<8x32xf32>
    %c0_51 = arith.constant 0 : index
    %c0_52 = arith.constant 0 : index
    %c0_53 = arith.constant 0 : index
    %80 = vector.load %arg19[%c0_51, %c0_52, %c0_53] : memref<7x8x32xf32, #tpu.memory_space<vmem>>, vector<1x8x32xf32>
    %81 = vector.shape_cast %80 : vector<1x8x32xf32> to vector<8x32xf32>
    %82 = vector.shape_cast %79 : vector<8x32xf32> to vector<1x8x32xf32>
    tpu.vector_store %arg19[%c0_51, %c0_52, %c0_53], %82 {strides = array<i32>} : memref<7x8x32xf32, #tpu.memory_space<vmem>>, vector<1x8x32xf32>,
    %cst_54 = arith.constant dense<0.000000e+00> : vector<8x96xf32>
    %83 = tpu.matmul %79, %7, %cst_54 {dimension_numbers = #tpu.dot_dimension_numbers<[1], [0], [0], [1], [0, 0, 1, 1], [], []>} : vector<8x32xf32>, vector<32x96xf32>, vector<8x96xf32> -> vector<8x96xf32>
    %c1 = arith.constant 1 : index
    %c0_55 = arith.constant 0 : index
    %c0_56 = arith.constant 0 : index
    %84 = vector.load %arg17[%c1, %c0_55, %c0_56] : memref<7x8x64xf32, #tpu.memory_space<vmem>>, vector<1x8x64xf32>
    %85 = vector.shape_cast %84 : vector<1x8x64xf32> to vector<8x64xf32>
    %86 = vector.extract_strided_slice %83 {offsets = [0, 0], sizes = [8, 64], strides = [1, 1]} : vector<8x96xf32> to vector<8x64xf32>
    %87 = arith.addf %85, %86 : vector<8x64xf32>
    %cst_57 = arith.constant 5.000000e-01 : f32
    %88 = vector.broadcast %cst_57 : f32 to vector<8x64xf32>
    %89 = arith.mulf %88, %87 : vector<8x64xf32>
    %90 = math.tanh %89 : vector<8x64xf32>
    %cst_58 = arith.constant 1.000000e+00 : f32
    %91 = vector.broadcast %cst_58 : f32 to vector<8x64xf32>
    %92 = arith.addf %90, %91 : vector<8x64xf32>
    %cst_59 = arith.constant 5.000000e-01 : f32
    %93 = vector.broadcast %cst_59 : f32 to vector<8x64xf32>
    %94 = arith.mulf %93, %92 : vector<8x64xf32>
    %95 = vector.extract_strided_slice %94 {offsets = [0, 0], sizes = [8, 32], strides = [1, 1]} : vector<8x64xf32> to vector<8x32xf32>
    %96 = vector.extract_strided_slice %94 {offsets = [0, 32], sizes = [8, 32], strides = [1, 1]} : vector<8x64xf32> to vector<8x32xf32>
    %c1_60 = arith.constant 1 : index
    %c0_61 = arith.constant 0 : index
    %c0_62 = arith.constant 0 : index
    %97 = vector.load %arg18[%c1_60, %c0_61, %c0_62] : memref<7x8x32xf32, #tpu.memory_space<vmem>>, vector<1x8x32xf32>
    %98 = vector.shape_cast %97 : vector<1x8x32xf32> to vector<8x32xf32>
    %99 = vector.extract_strided_slice %83 {offsets = [0, 64], sizes = [8, 32], strides = [1, 1]} : vector<8x96xf32> to vector<8x32xf32>
    %100 = arith.addf %99, %30 : vector<8x32xf32>
    %101 = arith.mulf %95, %100 : vector<8x32xf32>
    %102 = arith.addf %98, %101 : vector<8x32xf32>
    %103 = math.tanh %102 : vector<8x32xf32>
    %cst_63 = arith.constant 1.000000e+00 : f32
    %104 = vector.broadcast %cst_63 : f32 to vector<8x32xf32>
    %105 = arith.subf %104, %96 : vector<8x32xf32>
    %106 = arith.mulf %105, %103 : vector<8x32xf32>
    %107 = arith.mulf %96, %79 : vector<8x32xf32>
    %108 = arith.addf %106, %107 : vector<8x32xf32>
    %c1_64 = arith.constant 1 : index
    %c0_65 = arith.constant 0 : index
    %c0_66 = arith.constant 0 : index
    %109 = vector.load %arg19[%c1_64, %c0_65, %c0_66] : memref<7x8x32xf32, #tpu.memory_space<vmem>>, vector<1x8x32xf32>
    %110 = vector.shape_cast %109 : vector<1x8x32xf32> to vector<8x32xf32>
    %111 = vector.shape_cast %108 : vector<8x32xf32> to vector<1x8x32xf32>
    tpu.vector_store %arg19[%c1_64, %c0_65, %c0_66], %111 {strides = array<i32>} : memref<7x8x32xf32, #tpu.memory_space<vmem>>, vector<1x8x32xf32>,
    %cst_67 = arith.constant dense<0.000000e+00> : vector<8x96xf32>
    %112 = tpu.matmul %108, %7, %cst_67 {dimension_numbers = #tpu.dot_dimension_numbers<[1], [0], [0], [1], [0, 0, 1, 1], [], []>} : vector<8x32xf32>, vector<32x96xf32>, vector<8x96xf32> -> vector<8x96xf32>
    %c2 = arith.constant 2 : index
    %c0_68 = arith.constant 0 : index
    %c0_69 = arith.constant 0 : index
    %113 = vector.load %arg17[%c2, %c0_68, %c0_69] : memref<7x8x64xf32, #tpu.memory_space<vmem>>, vector<1x8x64xf32>
    %114 = vector.shape_cast %113 : vector<1x8x64xf32> to vector<8x64xf32>
    %115 = vector.extract_strided_slice %112 {offsets = [0, 0], sizes = [8, 64], strides = [1, 1]} : vector<8x96xf32> to vector<8x64xf32>
    %116 = arith.addf %114, %115 : vector<8x64xf32>
    %cst_70 = arith.constant 5.000000e-01 : f32
    %117 = vector.broadcast %cst_70 : f32 to vector<8x64xf32>
    %118 = arith.mulf %117, %116 : vector<8x64xf32>
    %119 = math.tanh %118 : vector<8x64xf32>
    %cst_71 = arith.constant 1.000000e+00 : f32
    %120 = vector.broadcast %cst_71 : f32 to vector<8x64xf32>
    %121 = arith.addf %119, %120 : vector<8x64xf32>
    %cst_72 = arith.constant 5.000000e-01 : f32
    %122 = vector.broadcast %cst_72 : f32 to vector<8x64xf32>
    %123 = arith.mulf %122, %121 : vector<8x64xf32>
    %124 = vector.extract_strided_slice %123 {offsets = [0, 0], sizes = [8, 32], strides = [1, 1]} : vector<8x64xf32> to vector<8x32xf32>
    %125 = vector.extract_strided_slice %123 {offsets = [0, 32], sizes = [8, 32], strides = [1, 1]} : vector<8x64xf32> to vector<8x32xf32>
    %c2_73 = arith.constant 2 : index
    %c0_74 = arith.constant 0 : index
    %c0_75 = arith.constant 0 : index
    %126 = vector.load %arg18[%c2_73, %c0_74, %c0_75] : memref<7x8x32xf32, #tpu.memory_space<vmem>>, vector<1x8x32xf32>
    %127 = vector.shape_cast %126 : vector<1x8x32xf32> to vector<8x32xf32>
    %128 = vector.extract_strided_slice %112 {offsets = [0, 64], sizes = [8, 32], strides = [1, 1]} : vector<8x96xf32> to vector<8x32xf32>
    %129 = arith.addf %128, %30 : vector<8x32xf32>
    %130 = arith.mulf %124, %129 : vector<8x32xf32>
    %131 = arith.addf %127, %130 : vector<8x32xf32>
    %132 = math.tanh %131 : vector<8x32xf32>
    %cst_76 = arith.constant 1.000000e+00 : f32
    %133 = vector.broadcast %cst_76 : f32 to vector<8x32xf32>
    %134 = arith.subf %133, %125 : vector<8x32xf32>
    %135 = arith.mulf %134, %132 : vector<8x32xf32>
    %136 = arith.mulf %125, %108 : vector<8x32xf32>
    %137 = arith.addf %135, %136 : vector<8x32xf32>
    %c2_77 = arith.constant 2 : index
    %c0_78 = arith.constant 0 : index
    %c0_79 = arith.constant 0 : index
    %138 = vector.load %arg19[%c2_77, %c0_78, %c0_79] : memref<7x8x32xf32, #tpu.memory_space<vmem>>, vector<1x8x32xf32>
    %139 = vector.shape_cast %138 : vector<1x8x32xf32> to vector<8x32xf32>
    %140 = vector.shape_cast %137 : vector<8x32xf32> to vector<1x8x32xf32>
    tpu.vector_store %arg19[%c2_77, %c0_78, %c0_79], %140 {strides = array<i32>} : memref<7x8x32xf32, #tpu.memory_space<vmem>>, vector<1x8x32xf32>,
    %cst_80 = arith.constant dense<0.000000e+00> : vector<8x96xf32>
    %141 = tpu.matmul %137, %7, %cst_80 {dimension_numbers = #tpu.dot_dimension_numbers<[1], [0], [0], [1], [0, 0, 1, 1], [], []>} : vector<8x32xf32>, vector<32x96xf32>, vector<8x96xf32> -> vector<8x96xf32>
    %c3 = arith.constant 3 : index
    %c0_81 = arith.constant 0 : index
    %c0_82 = arith.constant 0 : index
    %142 = vector.load %arg17[%c3, %c0_81, %c0_82] : memref<7x8x64xf32, #tpu.memory_space<vmem>>, vector<1x8x64xf32>
    %143 = vector.shape_cast %142 : vector<1x8x64xf32> to vector<8x64xf32>
    %144 = vector.extract_strided_slice %141 {offsets = [0, 0], sizes = [8, 64], strides = [1, 1]} : vector<8x96xf32> to vector<8x64xf32>
    %145 = arith.addf %143, %144 : vector<8x64xf32>
    %cst_83 = arith.constant 5.000000e-01 : f32
    %146 = vector.broadcast %cst_83 : f32 to vector<8x64xf32>
    %147 = arith.mulf %146, %145 : vector<8x64xf32>
    %148 = math.tanh %147 : vector<8x64xf32>
    %cst_84 = arith.constant 1.000000e+00 : f32
    %149 = vector.broadcast %cst_84 : f32 to vector<8x64xf32>
    %150 = arith.addf %148, %149 : vector<8x64xf32>
    %cst_85 = arith.constant 5.000000e-01 : f32
    %151 = vector.broadcast %cst_85 : f32 to vector<8x64xf32>
    %152 = arith.mulf %151, %150 : vector<8x64xf32>
    %153 = vector.extract_strided_slice %152 {offsets = [0, 0], sizes = [8, 32], strides = [1, 1]} : vector<8x64xf32> to vector<8x32xf32>
    %154 = vector.extract_strided_slice %152 {offsets = [0, 32], sizes = [8, 32], strides = [1, 1]} : vector<8x64xf32> to vector<8x32xf32>
    %c3_86 = arith.constant 3 : index
    %c0_87 = arith.constant 0 : index
    %c0_88 = arith.constant 0 : index
    %155 = vector.load %arg18[%c3_86, %c0_87, %c0_88] : memref<7x8x32xf32, #tpu.memory_space<vmem>>, vector<1x8x32xf32>
    %156 = vector.shape_cast %155 : vector<1x8x32xf32> to vector<8x32xf32>
    %157 = vector.extract_strided_slice %141 {offsets = [0, 64], sizes = [8, 32], strides = [1, 1]} : vector<8x96xf32> to vector<8x32xf32>
    %158 = arith.addf %157, %30 : vector<8x32xf32>
    %159 = arith.mulf %153, %158 : vector<8x32xf32>
    %160 = arith.addf %156, %159 : vector<8x32xf32>
    %161 = math.tanh %160 : vector<8x32xf32>
    %cst_89 = arith.constant 1.000000e+00 : f32
    %162 = vector.broadcast %cst_89 : f32 to vector<8x32xf32>
    %163 = arith.subf %162, %154 : vector<8x32xf32>
    %164 = arith.mulf %163, %161 : vector<8x32xf32>
    %165 = arith.mulf %154, %137 : vector<8x32xf32>
    %166 = arith.addf %164, %165 : vector<8x32xf32>
    %c3_90 = arith.constant 3 : index
    %c0_91 = arith.constant 0 : index
    %c0_92 = arith.constant 0 : index
    %167 = vector.load %arg19[%c3_90, %c0_91, %c0_92] : memref<7x8x32xf32, #tpu.memory_space<vmem>>, vector<1x8x32xf32>
    %168 = vector.shape_cast %167 : vector<1x8x32xf32> to vector<8x32xf32>
    %169 = vector.shape_cast %166 : vector<8x32xf32> to vector<1x8x32xf32>
    tpu.vector_store %arg19[%c3_90, %c0_91, %c0_92], %169 {strides = array<i32>} : memref<7x8x32xf32, #tpu.memory_space<vmem>>, vector<1x8x32xf32>,
    %cst_93 = arith.constant dense<0.000000e+00> : vector<8x96xf32>
    %170 = tpu.matmul %166, %7, %cst_93 {dimension_numbers = #tpu.dot_dimension_numbers<[1], [0], [0], [1], [0, 0, 1, 1], [], []>} : vector<8x32xf32>, vector<32x96xf32>, vector<8x96xf32> -> vector<8x96xf32>
    %c4 = arith.constant 4 : index
    %c0_94 = arith.constant 0 : index
    %c0_95 = arith.constant 0 : index
    %171 = vector.load %arg17[%c4, %c0_94, %c0_95] : memref<7x8x64xf32, #tpu.memory_space<vmem>>, vector<1x8x64xf32>
    %172 = vector.shape_cast %171 : vector<1x8x64xf32> to vector<8x64xf32>
    %173 = vector.extract_strided_slice %170 {offsets = [0, 0], sizes = [8, 64], strides = [1, 1]} : vector<8x96xf32> to vector<8x64xf32>
    %174 = arith.addf %172, %173 : vector<8x64xf32>
    %cst_96 = arith.constant 5.000000e-01 : f32
    %175 = vector.broadcast %cst_96 : f32 to vector<8x64xf32>
    %176 = arith.mulf %175, %174 : vector<8x64xf32>
    %177 = math.tanh %176 : vector<8x64xf32>
    %cst_97 = arith.constant 1.000000e+00 : f32
    %178 = vector.broadcast %cst_97 : f32 to vector<8x64xf32>
    %179 = arith.addf %177, %178 : vector<8x64xf32>
    %cst_98 = arith.constant 5.000000e-01 : f32
    %180 = vector.broadcast %cst_98 : f32 to vector<8x64xf32>
    %181 = arith.mulf %180, %179 : vector<8x64xf32>
    %182 = vector.extract_strided_slice %181 {offsets = [0, 0], sizes = [8, 32], strides = [1, 1]} : vector<8x64xf32> to vector<8x32xf32>
    %183 = vector.extract_strided_slice %181 {offsets = [0, 32], sizes = [8, 32], strides = [1, 1]} : vector<8x64xf32> to vector<8x32xf32>
    %c4_99 = arith.constant 4 : index
    %c0_100 = arith.constant 0 : index
    %c0_101 = arith.constant 0 : index
    %184 = vector.load %arg18[%c4_99, %c0_100, %c0_101] : memref<7x8x32xf32, #tpu.memory_space<vmem>>, vector<1x8x32xf32>
    %185 = vector.shape_cast %184 : vector<1x8x32xf32> to vector<8x32xf32>
    %186 = vector.extract_strided_slice %170 {offsets = [0, 64], sizes = [8, 32], strides = [1, 1]} : vector<8x96xf32> to vector<8x32xf32>
    %187 = arith.addf %186, %30 : vector<8x32xf32>
    %188 = arith.mulf %182, %187 : vector<8x32xf32>
    %189 = arith.addf %185, %188 : vector<8x32xf32>
    %190 = math.tanh %189 : vector<8x32xf32>
    %cst_102 = arith.constant 1.000000e+00 : f32
    %191 = vector.broadcast %cst_102 : f32 to vector<8x32xf32>
    %192 = arith.subf %191, %183 : vector<8x32xf32>
    %193 = arith.mulf %192, %190 : vector<8x32xf32>
    %194 = arith.mulf %183, %166 : vector<8x32xf32>
    %195 = arith.addf %193, %194 : vector<8x32xf32>
    %c4_103 = arith.constant 4 : index
    %c0_104 = arith.constant 0 : index
    %c0_105 = arith.constant 0 : index
    %196 = vector.load %arg19[%c4_103, %c0_104, %c0_105] : memref<7x8x32xf32, #tpu.memory_space<vmem>>, vector<1x8x32xf32>
    %197 = vector.shape_cast %196 : vector<1x8x32xf32> to vector<8x32xf32>
    %198 = vector.shape_cast %195 : vector<8x32xf32> to vector<1x8x32xf32>
    tpu.vector_store %arg19[%c4_103, %c0_104, %c0_105], %198 {strides = array<i32>} : memref<7x8x32xf32, #tpu.memory_space<vmem>>, vector<1x8x32xf32>,
    %cst_106 = arith.constant dense<0.000000e+00> : vector<8x96xf32>
    %199 = tpu.matmul %195, %7, %cst_106 {dimension_numbers = #tpu.dot_dimension_numbers<[1], [0], [0], [1], [0, 0, 1, 1], [], []>} : vector<8x32xf32>, vector<32x96xf32>, vector<8x96xf32> -> vector<8x96xf32>
    %c5 = arith.constant 5 : index
    %c0_107 = arith.constant 0 : index
    %c0_108 = arith.constant 0 : index
    %200 = vector.load %arg17[%c5, %c0_107, %c0_108] : memref<7x8x64xf32, #tpu.memory_space<vmem>>, vector<1x8x64xf32>
    %201 = vector.shape_cast %200 : vector<1x8x64xf32> to vector<8x64xf32>
    %202 = vector.extract_strided_slice %199 {offsets = [0, 0], sizes = [8, 64], strides = [1, 1]} : vector<8x96xf32> to vector<8x64xf32>
    %203 = arith.addf %201, %202 : vector<8x64xf32>
    %cst_109 = arith.constant 5.000000e-01 : f32
    %204 = vector.broadcast %cst_109 : f32 to vector<8x64xf32>
    %205 = arith.mulf %204, %203 : vector<8x64xf32>
    %206 = math.tanh %205 : vector<8x64xf32>
    %cst_110 = arith.constant 1.000000e+00 : f32
    %207 = vector.broadcast %cst_110 : f32 to vector<8x64xf32>
    %208 = arith.addf %206, %207 : vector<8x64xf32>
    %cst_111 = arith.constant 5.000000e-01 : f32
    %209 = vector.broadcast %cst_111 : f32 to vector<8x64xf32>
    %210 = arith.mulf %209, %208 : vector<8x64xf32>
    %211 = vector.extract_strided_slice %210 {offsets = [0, 0], sizes = [8, 32], strides = [1, 1]} : vector<8x64xf32> to vector<8x32xf32>
    %212 = vector.extract_strided_slice %210 {offsets = [0, 32], sizes = [8, 32], strides = [1, 1]} : vector<8x64xf32> to vector<8x32xf32>
    %c5_112 = arith.constant 5 : index
    %c0_113 = arith.constant 0 : index
    %c0_114 = arith.constant 0 : index
    %213 = vector.load %arg18[%c5_112, %c0_113, %c0_114] : memref<7x8x32xf32, #tpu.memory_space<vmem>>, vector<1x8x32xf32>
    %214 = vector.shape_cast %213 : vector<1x8x32xf32> to vector<8x32xf32>
    %215 = vector.extract_strided_slice %199 {offsets = [0, 64], sizes = [8, 32], strides = [1, 1]} : vector<8x96xf32> to vector<8x32xf32>
    %216 = arith.addf %215, %30 : vector<8x32xf32>
    %217 = arith.mulf %211, %216 : vector<8x32xf32>
    %218 = arith.addf %214, %217 : vector<8x32xf32>
    %219 = math.tanh %218 : vector<8x32xf32>
    %cst_115 = arith.constant 1.000000e+00 : f32
    %220 = vector.broadcast %cst_115 : f32 to vector<8x32xf32>
    %221 = arith.subf %220, %212 : vector<8x32xf32>
    %222 = arith.mulf %221, %219 : vector<8x32xf32>
    %223 = arith.mulf %212, %195 : vector<8x32xf32>
    %224 = arith.addf %222, %223 : vector<8x32xf32>
    %c5_116 = arith.constant 5 : index
    %c0_117 = arith.constant 0 : index
    %c0_118 = arith.constant 0 : index
    %225 = vector.load %arg19[%c5_116, %c0_117, %c0_118] : memref<7x8x32xf32, #tpu.memory_space<vmem>>, vector<1x8x32xf32>
    %226 = vector.shape_cast %225 : vector<1x8x32xf32> to vector<8x32xf32>
    %227 = vector.shape_cast %224 : vector<8x32xf32> to vector<1x8x32xf32>
    tpu.vector_store %arg19[%c5_116, %c0_117, %c0_118], %227 {strides = array<i32>} : memref<7x8x32xf32, #tpu.memory_space<vmem>>, vector<1x8x32xf32>,
    %cst_119 = arith.constant dense<0.000000e+00> : vector<8x96xf32>
    %228 = tpu.matmul %224, %7, %cst_119 {dimension_numbers = #tpu.dot_dimension_numbers<[1], [0], [0], [1], [0, 0, 1, 1], [], []>} : vector<8x32xf32>, vector<32x96xf32>, vector<8x96xf32> -> vector<8x96xf32>
    %c6 = arith.constant 6 : index
    %c0_120 = arith.constant 0 : index
    %c0_121 = arith.constant 0 : index
    %229 = vector.load %arg17[%c6, %c0_120, %c0_121] : memref<7x8x64xf32, #tpu.memory_space<vmem>>, vector<1x8x64xf32>
    %230 = vector.shape_cast %229 : vector<1x8x64xf32> to vector<8x64xf32>
    %231 = vector.extract_strided_slice %228 {offsets = [0, 0], sizes = [8, 64], strides = [1, 1]} : vector<8x96xf32> to vector<8x64xf32>
    %232 = arith.addf %230, %231 : vector<8x64xf32>
    %cst_122 = arith.constant 5.000000e-01 : f32
    %233 = vector.broadcast %cst_122 : f32 to vector<8x64xf32>
    %234 = arith.mulf %233, %232 : vector<8x64xf32>
    %235 = math.tanh %234 : vector<8x64xf32>
    %cst_123 = arith.constant 1.000000e+00 : f32
    %236 = vector.broadcast %cst_123 : f32 to vector<8x64xf32>
    %237 = arith.addf %235, %236 : vector<8x64xf32>
    %cst_124 = arith.constant 5.000000e-01 : f32
    %238 = vector.broadcast %cst_124 : f32 to vector<8x64xf32>
    %239 = arith.mulf %238, %237 : vector<8x64xf32>
    %240 = vector.extract_strided_slice %239 {offsets = [0, 0], sizes = [8, 32], strides = [1, 1]} : vector<8x64xf32> to vector<8x32xf32>
    %241 = vector.extract_strided_slice %239 {offsets = [0, 32], sizes = [8, 32], strides = [1, 1]} : vector<8x64xf32> to vector<8x32xf32>
    %c6_125 = arith.constant 6 : index
    %c0_126 = arith.constant 0 : index
    %c0_127 = arith.constant 0 : index
    %242 = vector.load %arg18[%c6_125, %c0_126, %c0_127] : memref<7x8x32xf32, #tpu.memory_space<vmem>>, vector<1x8x32xf32>
    %243 = vector.shape_cast %242 : vector<1x8x32xf32> to vector<8x32xf32>
    %244 = vector.extract_strided_slice %228 {offsets = [0, 64], sizes = [8, 32], strides = [1, 1]} : vector<8x96xf32> to vector<8x32xf32>
    %245 = arith.addf %244, %30 : vector<8x32xf32>
    %246 = arith.mulf %240, %245 : vector<8x32xf32>
    %247 = arith.addf %243, %246 : vector<8x32xf32>
    %248 = math.tanh %247 : vector<8x32xf32>
    %cst_128 = arith.constant 1.000000e+00 : f32
    %249 = vector.broadcast %cst_128 : f32 to vector<8x32xf32>
    %250 = arith.subf %249, %241 : vector<8x32xf32>
    %251 = arith.mulf %250, %248 : vector<8x32xf32>
    %252 = arith.mulf %241, %224 : vector<8x32xf32>
    %253 = arith.addf %251, %252 : vector<8x32xf32>
    %c6_129 = arith.constant 6 : index
    %c0_130 = arith.constant 0 : index
    %c0_131 = arith.constant 0 : index
    %254 = vector.load %arg19[%c6_129, %c0_130, %c0_131] : memref<7x8x32xf32, #tpu.memory_space<vmem>>, vector<1x8x32xf32>
    %255 = vector.shape_cast %254 : vector<1x8x32xf32> to vector<8x32xf32>
    %256 = vector.shape_cast %253 : vector<8x32xf32> to vector<1x8x32xf32>
    tpu.vector_store %arg19[%c6_129, %c0_130, %c0_131], %256 {strides = array<i32>} : memref<7x8x32xf32, #tpu.memory_space<vmem>>, vector<1x8x32xf32>,
    %c0_132 = arith.constant 0 : index
    %c0_133 = arith.constant 0 : index
    %c0_134 = arith.constant 0 : index
    %257 = vector.load %arg19[%c0_132, %c0_133, %c0_134] : memref<7x8x32xf32, #tpu.memory_space<vmem>>, vector<7x8x32xf32>
    %258 = vector.shape_cast %257 : vector<7x8x32xf32> to vector<56x32xf32>
    %cst_135 = arith.constant dense<0.000000e+00> : vector<56x32xf32>
    %259 = tpu.matmul %258, %9, %cst_135 {dimension_numbers = #tpu.dot_dimension_numbers<[1], [0], [0], [1], [0, 0, 1, 1], [], []>} : vector<56x32xf32>, vector<32x32xf32>, vector<56x32xf32> -> vector<56x32xf32>
    %260 = vector.broadcast %10 : vector<1x32xf32> to vector<56x32xf32>
    %261 = arith.addf %259, %260 : vector<56x32xf32>
    %262 = math.tanh %261 : vector<56x32xf32>
    %cst_136 = arith.constant dense<0.000000e+00> : vector<56x5xf32>
    %263 = tpu.matmul %262, %11, %cst_136 {dimension_numbers = #tpu.dot_dimension_numbers<[1], [0], [0], [1], [0, 0, 1, 1], [], []>} : vector<56x32xf32>, vector<32x5xf32>, vector<56x5xf32> -> vector<56x5xf32>
    %264 = vector.broadcast %12 : vector<1x5xf32> to vector<56x5xf32>
    %265 = arith.addf %263, %264 : vector<56x5xf32>
    %cst_137 = arith.constant 0.000000e+00 : f32
    %266 = vector.broadcast %cst_137 : f32 to vector<8x1xf32>
    %267 = vector.extract_strided_slice %1 {offsets = [1, 0, 4], sizes = [1, 8, 1], strides = [1, 1, 1]} : vector<7x8x5xf32> to vector<1x8x1xf32>
    %268 = vector.shape_cast %267 : vector<1x8x1xf32> to vector<8x1xf32>
    %269 = arith.maximumf %266, %268 : vector<8x1xf32>
    %270 = vector.extract_strided_slice %1 {offsets = [2, 0, 4], sizes = [1, 8, 1], strides = [1, 1, 1]} : vector<7x8x5xf32> to vector<1x8x1xf32>
    %271 = vector.shape_cast %270 : vector<1x8x1xf32> to vector<8x1xf32>
    %272 = arith.maximumf %269, %271 : vector<8x1xf32>
    %273 = vector.extract_strided_slice %1 {offsets = [3, 0, 4], sizes = [1, 8, 1], strides = [1, 1, 1]} : vector<7x8x5xf32> to vector<1x8x1xf32>
    %274 = vector.shape_cast %273 : vector<1x8x1xf32> to vector<8x1xf32>
    %275 = arith.maximumf %272, %274 : vector<8x1xf32>
    %276 = vector.extract_strided_slice %1 {offsets = [4, 0, 4], sizes = [1, 8, 1], strides = [1, 1, 1]} : vector<7x8x5xf32> to vector<1x8x1xf32>
    %277 = vector.shape_cast %276 : vector<1x8x1xf32> to vector<8x1xf32>
    %278 = arith.maximumf %275, %277 : vector<8x1xf32>
    %279 = vector.extract_strided_slice %1 {offsets = [5, 0, 4], sizes = [1, 8, 1], strides = [1, 1, 1]} : vector<7x8x5xf32> to vector<1x8x1xf32>
    %280 = vector.shape_cast %279 : vector<1x8x1xf32> to vector<8x1xf32>
    %281 = arith.maximumf %278, %280 : vector<8x1xf32>
    %282 = vector.extract_strided_slice %1 {offsets = [6, 0, 4], sizes = [1, 8, 1], strides = [1, 1, 1]} : vector<7x8x5xf32> to vector<1x8x1xf32>
    %283 = vector.shape_cast %282 : vector<1x8x1xf32> to vector<8x1xf32>
    %284 = arith.maximumf %281, %283 : vector<8x1xf32>
    %285 = tpu.concatenate %266, %269, %272, %275, %278, %281, %284 in 0 : vector<8x1xf32>, vector<8x1xf32>, vector<8x1xf32>, vector<8x1xf32>, vector<8x1xf32>, vector<8x1xf32>, vector<8x1xf32> -> vector<56x1xf32>
    %286 = tpu.iota {dimensions = array<i32: 1>} : vector<1x5xi32>
    %c4_i32 = arith.constant 4 : i32
    %287 = vector.broadcast %c4_i32 : i32 to vector<1x5xi32>
    %288 = arith.cmpi eq, %286, %287 : vector<1x5xi32>
    %cst_138 = arith.constant 0.000000e+00 : f32
    %cst_139 = arith.constant -1.000000e+30 : f32
    %289 = vector.broadcast %cst_138 : f32 to vector<1x5xf32>
    %290 = vector.broadcast %cst_139 : f32 to vector<1x5xf32>
    %291 = arith.select %288, %289, %290 : vector<1x5xi1>, vector<1x5xf32>
    %292 = vector.broadcast %285 : vector<56x1xf32> to vector<56x5xf32>
    %293 = vector.broadcast %291 : vector<1x5xf32> to vector<56x5xf32>
    %294 = arith.mulf %292, %293 : vector<56x5xf32>
    %295 = arith.addf %265, %294 : vector<56x5xf32>
    %296 = tpu.iota {dimensions = array<i32: 1>} : vector<56x5xi32>
    %297 = arith.sitofp %296 : vector<56x5xi32> to vector<56x5xf32>
    %cst_140 = arith.constant dense<0xFF800000> : vector<56xf32>
    %298 = vector.multi_reduction <maximumf>, %295, %cst_140 [1] : vector<56x5xf32> to vector<56xf32>
    %299 = vector.shape_cast %298 : vector<56xf32> to vector<56x1xf32>
    %300 = vector.broadcast %299 : vector<56x1xf32> to vector<56x5xf32>
    %301 = arith.cmpf oeq, %295, %300 : vector<56x5xf32>
    %cst_141 = arith.constant 5.000000e+00 : f32
    %302 = vector.broadcast %cst_141 : f32 to vector<56x5xf32>
    %303 = arith.select %301, %297, %302 : vector<56x5xi1>, vector<56x5xf32>
    %cst_142 = arith.constant dense<0x7F800000> : vector<56xf32>
    %304 = vector.multi_reduction <minimumf>, %303, %cst_142 [1] : vector<56x5xf32> to vector<56xf32>
    %305 = vector.shape_cast %304 : vector<56xf32> to vector<56x1xf32>
    %306 = arith.fptosi %305 : vector<56x1xf32> to vector<56x1xi32>
    %307 = vector.shape_cast %265 : vector<56x5xf32> to vector<7x8x5xf32>
    %308 = vector.shape_cast %306 : vector<56x1xi32> to vector<7x8x1xi32>
    %309 = vector.extract_strided_slice %307 {offsets = [0, 0, 0], sizes = [1, 8, 5], strides = [1, 1, 1]} : vector<7x8x5xf32> to vector<1x8x5xf32>
    %310 = vector.shape_cast %309 : vector<1x8x5xf32> to vector<8x5xf32>
    %311 = vector.extract_strided_slice %307 {offsets = [1, 0, 0], sizes = [1, 8, 5], strides = [1, 1, 1]} : vector<7x8x5xf32> to vector<1x8x5xf32>
    %312 = vector.shape_cast %311 : vector<1x8x5xf32> to vector<8x5xf32>
    %313 = vector.extract_strided_slice %307 {offsets = [2, 0, 0], sizes = [1, 8, 5], strides = [1, 1, 1]} : vector<7x8x5xf32> to vector<1x8x5xf32>
    %314 = vector.shape_cast %313 : vector<1x8x5xf32> to vector<8x5xf32>
    %315 = vector.extract_strided_slice %307 {offsets = [3, 0, 0], sizes = [1, 8, 5], strides = [1, 1, 1]} : vector<7x8x5xf32> to vector<1x8x5xf32>
    %316 = vector.shape_cast %315 : vector<1x8x5xf32> to vector<8x5xf32>
    %317 = vector.extract_strided_slice %307 {offsets = [4, 0, 0], sizes = [1, 8, 5], strides = [1, 1, 1]} : vector<7x8x5xf32> to vector<1x8x5xf32>
    %318 = vector.shape_cast %317 : vector<1x8x5xf32> to vector<8x5xf32>
    %319 = vector.extract_strided_slice %307 {offsets = [5, 0, 0], sizes = [1, 8, 5], strides = [1, 1, 1]} : vector<7x8x5xf32> to vector<1x8x5xf32>
    %320 = vector.shape_cast %319 : vector<1x8x5xf32> to vector<8x5xf32>
    %321 = vector.extract_strided_slice %307 {offsets = [6, 0, 0], sizes = [1, 8, 5], strides = [1, 1, 1]} : vector<7x8x5xf32> to vector<1x8x5xf32>
    %322 = vector.shape_cast %321 : vector<1x8x5xf32> to vector<8x5xf32>
    %323 = tpu.concatenate %310, %312, %314, %316, %318, %320, %322 in 1 : vector<8x5xf32>, vector<8x5xf32>, vector<8x5xf32>, vector<8x5xf32>, vector<8x5xf32>, vector<8x5xf32>, vector<8x5xf32> -> vector<8x35xf32>
    %c0_143 = arith.constant 0 : index
    %c0_144 = arith.constant 0 : index
    %324 = vector.load %arg16[%c0_143, %c0_144] : memref<8x35xf32, #tpu.memory_space<vmem>>, vector<8x35xf32>
    tpu.vector_store %arg16[%c0_143, %c0_144], %323 {strides = array<i32>} : memref<8x35xf32, #tpu.memory_space<vmem>>, vector<8x35xf32>,
    %325 = vector.extract_strided_slice %308 {offsets = [0, 0, 0], sizes = [1, 8, 1], strides = [1, 1, 1]} : vector<7x8x1xi32> to vector<1x8x1xi32>
    %326 = vector.shape_cast %325 : vector<1x8x1xi32> to vector<8x1xi32>
    %327 = vector.extract_strided_slice %308 {offsets = [1, 0, 0], sizes = [1, 8, 1], strides = [1, 1, 1]} : vector<7x8x1xi32> to vector<1x8x1xi32>
    %328 = vector.shape_cast %327 : vector<1x8x1xi32> to vector<8x1xi32>
    %329 = vector.extract_strided_slice %308 {offsets = [2, 0, 0], sizes = [1, 8, 1], strides = [1, 1, 1]} : vector<7x8x1xi32> to vector<1x8x1xi32>
    %330 = vector.shape_cast %329 : vector<1x8x1xi32> to vector<8x1xi32>
    %331 = vector.extract_strided_slice %308 {offsets = [3, 0, 0], sizes = [1, 8, 1], strides = [1, 1, 1]} : vector<7x8x1xi32> to vector<1x8x1xi32>
    %332 = vector.shape_cast %331 : vector<1x8x1xi32> to vector<8x1xi32>
    %333 = vector.extract_strided_slice %308 {offsets = [4, 0, 0], sizes = [1, 8, 1], strides = [1, 1, 1]} : vector<7x8x1xi32> to vector<1x8x1xi32>
    %334 = vector.shape_cast %333 : vector<1x8x1xi32> to vector<8x1xi32>
    %335 = vector.extract_strided_slice %308 {offsets = [5, 0, 0], sizes = [1, 8, 1], strides = [1, 1, 1]} : vector<7x8x1xi32> to vector<1x8x1xi32>
    %336 = vector.shape_cast %335 : vector<1x8x1xi32> to vector<8x1xi32>
    %337 = vector.extract_strided_slice %308 {offsets = [6, 0, 0], sizes = [1, 8, 1], strides = [1, 1, 1]} : vector<7x8x1xi32> to vector<1x8x1xi32>
    %338 = vector.shape_cast %337 : vector<1x8x1xi32> to vector<8x1xi32>
    %339 = tpu.concatenate %326, %328, %330, %332, %334, %336, %338 in 1 : vector<8x1xi32>, vector<8x1xi32>, vector<8x1xi32>, vector<8x1xi32>, vector<8x1xi32>, vector<8x1xi32>, vector<8x1xi32> -> vector<8x7xi32>
    %c0_145 = arith.constant 0 : index
    %c0_146 = arith.constant 0 : index
    %340 = vector.load %arg15[%c0_145, %c0_146] : memref<8x7xi32, #tpu.memory_space<vmem>>, vector<8x7xi32>
    tpu.vector_store %arg15[%c0_145, %c0_146], %339 {strides = array<i32>} : memref<8x7xi32, #tpu.memory_space<vmem>>, vector<8x7xi32>,
    return
  }
  func.func @transform_0(%arg0: i32) -> (i32, i32) {
    %c0_i32 = arith.constant 0 : i32
    %c0_i32_0 = arith.constant 0 : i32
    return %arg0, %c0_i32 : i32, i32
  }
  func.func @transform_1(%arg0: i32) -> (i32, i32, i32) {
    %c0_i32 = arith.constant 0 : i32
    %c0_i32_0 = arith.constant 0 : i32
    %c0_i32_1 = arith.constant 0 : i32
    return %c0_i32, %arg0, %c0_i32_0 : i32, i32, i32
  }
  func.func @transform_2(%arg0: i32) -> (i32, i32, i32) {
    %c0_i32 = arith.constant 0 : i32
    %c0_i32_0 = arith.constant 0 : i32
    %c0_i32_1 = arith.constant 0 : i32
    return %c0_i32, %arg0, %c0_i32_0 : i32, i32, i32
  }
  func.func @transform_3(%arg0: i32) -> (i32, i32) {
    %c0_i32 = arith.constant 0 : i32
    %c0_i32_0 = arith.constant 0 : i32
    %c0_i32_1 = arith.constant 0 : i32
    return %c0_i32, %c0_i32_0 : i32, i32
  }
  func.func @transform_4(%arg0: i32) -> (i32, i32) {
    %c0_i32 = arith.constant 0 : i32
    %c0_i32_0 = arith.constant 0 : i32
    %c0_i32_1 = arith.constant 0 : i32
    return %c0_i32, %c0_i32_0 : i32, i32
  }
  func.func @transform_5(%arg0: i32) -> (i32, i32) {
    %c0_i32 = arith.constant 0 : i32
    %c0_i32_0 = arith.constant 0 : i32
    %c0_i32_1 = arith.constant 0 : i32
    return %c0_i32, %c0_i32_0 : i32, i32
  }
  func.func @transform_6(%arg0: i32) -> (i32, i32) {
    %c0_i32 = arith.constant 0 : i32
    %c0_i32_0 = arith.constant 0 : i32
    %c0_i32_1 = arith.constant 0 : i32
    return %c0_i32, %c0_i32_0 : i32, i32
  }
  func.func @transform_7(%arg0: i32) -> (i32, i32) {
    %c0_i32 = arith.constant 0 : i32
    %c0_i32_0 = arith.constant 0 : i32
    %c0_i32_1 = arith.constant 0 : i32
    return %c0_i32, %c0_i32_0 : i32, i32
  }
  func.func @transform_8(%arg0: i32) -> (i32, i32) {
    %c0_i32 = arith.constant 0 : i32
    %c0_i32_0 = arith.constant 0 : i32
    %c0_i32_1 = arith.constant 0 : i32
    return %c0_i32, %c0_i32_0 : i32, i32
  }
  func.func @transform_9(%arg0: i32) -> (i32, i32) {
    %c0_i32 = arith.constant 0 : i32
    %c0_i32_0 = arith.constant 0 : i32
    %c0_i32_1 = arith.constant 0 : i32
    return %c0_i32, %c0_i32_0 : i32, i32
  }
  func.func @transform_10(%arg0: i32) -> (i32, i32) {
    %c0_i32 = arith.constant 0 : i32
    %c0_i32_0 = arith.constant 0 : i32
    %c0_i32_1 = arith.constant 0 : i32
    return %c0_i32, %c0_i32_0 : i32, i32
  }
  func.func @transform_11(%arg0: i32) -> (i32, i32) {
    %c0_i32 = arith.constant 0 : i32
    %c0_i32_0 = arith.constant 0 : i32
    %c0_i32_1 = arith.constant 0 : i32
    return %c0_i32, %c0_i32_0 : i32, i32
  }
  func.func @transform_12(%arg0: i32) -> (i32, i32) {
    %c0_i32 = arith.constant 0 : i32
    %c0_i32_0 = arith.constant 0 : i32
    %c0_i32_1 = arith.constant 0 : i32
    return %c0_i32, %c0_i32_0 : i32, i32
  }
  func.func @transform_13(%arg0: i32) -> (i32, i32) {
    %c0_i32 = arith.constant 0 : i32
    %c0_i32_0 = arith.constant 0 : i32
    %c0_i32_1 = arith.constant 0 : i32
    return %c0_i32, %c0_i32_0 : i32, i32
  }
  func.func @transform_14(%arg0: i32) -> (i32, i32) {
    %c0_i32 = arith.constant 0 : i32
    %c0_i32_0 = arith.constant 0 : i32
    return %arg0, %c0_i32 : i32, i32
  }
  func.func @transform_15(%arg0: i32) -> (i32, i32) {
    %c0_i32 = arith.constant 0 : i32
    %c0_i32_0 = arith.constant 0 : i32
    return %arg0, %c0_i32 : i32, i32
  }
}

</mosaic_0001>

<bundles_post_ra>
// kernel: trajectory_sequence_decoder_forward.1
= control target key start
LH: loop header
LB: loop body
LE: loop exit
PB: predicated region body
PF: predicated region fallthrough
CT: control target
= control target key end

     0   :  { %v2196_v0 = vmov 0.0   ;;  %vm2197_vm0 = vmmov 0   ;;  %vm87_vm1 = vcmask 130048   ;;  %s2198_s28 = smov 32   ;;  %vm171_vm2 = vcmask 261120   ;;  %s2200_s23 = smov 96   ;;  %s2874_s6 = inlined_call_operand.vmem [shape: f32[80,96], index: 6, kind: input, shape index: {}]   ;;  %s2875_s5 = inlined_call_operand.vmem [shape: f32[5,16], index: 5, kind: input, shape index: {}]   ;;  %s2876_s3 = inlined_call_operand.vmem [shape: f32[16,32], index: 3, kind: input, shape index: {}]   ;;  %s2877_s2 = inlined_call_operand.vmem [shape: f32[7,8,5], index: 2, kind: input, shape index: {}]   ;;  %s2878_s1 = inlined_call_operand.vmem [shape: f32[7,8,16], index: 1, kind: input, shape index: {}]   ;;  %s2879_s8 = inlined_call_operand.vmem [shape: f32[32,96], index: 8, kind: input, shape index: {}]   ;;  %s2880_s0 = inlined_call_operand.vmem [shape: f32[8,32], index: 0, kind: input, shape index: {}]   ;;  %s2881_s9 = inlined_call_operand.vmem [shape: f32[1,96], index: 9, kind: input, shape index: {}]   ;;  %s2882_s4 = inlined_call_operand.vmem [shape: f32[1,32], index: 4, kind: input, shape index: {}]   ;;  %s2883_s7 = inlined_call_operand.vmem [shape: f32[1,96], index: 7, kind: input, shape index: {}]   ;;  %s2884_s10 = inlined_call_operand.vmem [shape: f32[32,32], index: 10, kind: input, shape index: {}]   ;;  %s2885_s11 = inlined_call_operand.vmem [shape: f32[1,32], index: 11, kind: input, shape index: {}]   ;;  %s2886_s12 = inlined_call_operand.vmem [shape: f32[32,5], index: 12, kind: input, shape index: {}]   ;;  %s2887_s13 = inlined_call_operand.vmem [shape: f32[1,5], index: 13, kind: input, shape index: {}]   ;;  %s2888_s14 = inlined_call_operand.vmem [shape: s32[8,7], index: 14, kind: output, shape index: {0}]   ;;  %s2889_s15 = inlined_call_operand.vmem [shape: f32[8,35], index: 15, kind: output, shape index: {1}]  }
   0x1   :  { %1915 = vmatprep.subr.mxu0 %v2196_v0  ;;  %v70_v1 = vld [vmem:[%s2874_s6 + $0x48] sm:$0xff]  ;;  %v69_v2 = vld [vmem:[%s2874_s6 + $0x40] sm:$0xff]  ;;  %1919 = vmatprep.mubr.msk.f32.mxu0 %vm2197_vm0, %v2196_v0  ;;  %v2327_v8 = vld [vmem:[%s2879_s8 + $0x18] sm:$0xff]  ;;  %v161_v23 = vlaneseq  ;;  %vm454_vm4 = vcmask 1044480   ;;  %vm432_vm5 = vcmask 302080   ;;  %vm565_vm6 = vcmask 523264  }
   0x2   :  { %1916 = vmatpush3.msra.mxu0 %v70_v1  ;;  %v60_v3 = vld [vmem:[%s2875_s5] sm:$0x1f]  ;;  %1922 = vmatprep.subr.mxu1 %v2196_v0  ;;  %v58_v4 = vld [vmem:[%s2876_s3 + $0x8] sm:$0xff]  ;;  %v64_v9 = vld [vmem:[%s2874_s6 + $0x18] sm:$0xff]  ;;  %vm1665_vm8 = vcmask 39936   ;;  %s2206_s27 = smov 5  }
   0x3   :  { %1917 = vmatprep.subr.mxu0 %v2196_v0  ;;  %v50_v5 = vld [vmem:[%s2877_s2] sm:$0xff]  ;;  %1930 = vmatprep.mubr.msk.f32.mxu1 %vm2197_vm0, %v2196_v0  ;;  %v2337_v10 = vld [vmem:[%s2879_s8 + $0x10] sm:$0xff]  ;;  %v257_v12 = vld [vmem:[%s2878_s1 + $0x8] sm:$0xff]  ;;  %v2429_v24 = vshrl.u32 %v161_v23, 7  ;;  %v2431_v25 = vand.u32 127, %v161_v23  ;;  %s2208_s5 = smov 30  }
   0x4   :  { %1918 = vmatpush3.msra.mxu0 %v69_v2  ;;  %404 = vrot.lane.b32.xlu0 %v50_v5, %s2198_s28  ;;  %v57_v6 = vld [vmem:[%s2876_s3] sm:$0xff]  ;;  %v63_v11 = vld [vmem:[%s2874_s6 + $0x10] sm:$0xff]  ;;  %v2352_v13 = vld [vmem:[%s2879_s8 + $0x8] sm:$0xff]  ;;  %s2209_s29 = smov 25  }
   0x5   :  { %1920 = vmatmul.mubr.msk.f32.vlgmr.msra.gmra.mxu0 %vm87_vm1, %v60_v3  ;;  %1933 = vmatprep.subr.mxu0 %v2196_v0  ;;  %v256_v7 = vld [vmem:[%s2878_s1] sm:$0xff]  ;;  %v62_v15 = vld [vmem:[%s2874_s6 + $0x8] sm:$0xff]  ;;  %v258_v16 = vld [vmem:[%s2878_s1 + $0x10] sm:$0xff]  ;;  %v247_v27 = vsub.s32 0, %v2429_v24  ;;  %vm163_vm3 = vcmp.lt.s32.totalorder %v2431_v25, 64  ;;  %vm1619_vm7 = vcmp.eq.s32.totalorder %v2431_v25, 4 }
   0x6   :  { %1934 = vmatpush3.msra.mxu0 %v58_v4  ;;  %1937 = vmatprep.mubr.msk.f32.mxu0 %vm2197_vm0, %v2196_v0  ;;  %v2361_v14 = vld [vmem:[%s2879_s8] sm:$0xff]  ;;  %v259_v18 = vld [vmem:[%s2878_s1 + $0x18] sm:$0xff]  ;;  %v261_v21 = vld [vmem:[%s2878_s1 + $0x28] sm:$0xff] }
   0x7   :  { %1935 = vmatprep.subr.mxu0 %v2196_v0  ;;  %1923 = vmatpush3.msra.mxu1 %v64_v9  ;;  %v61_v17 = vld [vmem:[%s2874_s6] sm:$0xff]  ;;  %v262_v22 = vld [vmem:[%s2878_s1 + $0x30] sm:$0xff]  ;;  %v68_v31 = vld [vmem:[%s2874_s6 + $0x38] sm:$0xff] }
   0x8   :  { %1936 = vmatpush3.msra.mxu0 %v57_v6  ;;  %1924 = vmatprep.subr.mxu1 %v2196_v0  ;;  %v2388_v19 = vld [vmem:[%s2880_s0] sm:$0xff]  ;;  %v67_v34 = vld [vmem:[%s2874_s6 + $0x30] sm:$0xff]  ;;  %v66_v36 = vld [vmem:[%s2874_s6 + $0x28] sm:$0xff] }
   0x9   :  { %1938 = vmatmul.mubr.msk.f32.vlgmr.msra.gmra.mxu0 %vm87_vm1, %v256_v7  ;;  %1989 = vmatprep.subr.mxu0 %v2196_v0  ;;  %v260_v20 = vld [vmem:[%s2878_s1 + $0x20] sm:$0xff]  ;;  %s2207_s1 = smov 20  }
   0xa   :  { %1940 = vmatprep.mubr.msk.f32.mxu0 %vm2197_vm0, %v2196_v0  ;;  %1990 = vmatpush3.msra.mxu0 %v2327_v8  ;;  %v2436_v26 = vld [vmem:[%s2881_s9] sm:$0x1] }
   0xb   :  { %1991 = vmatprep.subr.mxu0 %v2196_v0  ;;  %1925 = vmatpush3.msra.mxu1 %v63_v11  ;;  %v164_v28 = vsel %vm163_vm3, %v2436_v26, 0.0  ;;  %v1790_v33 = vld [vmem:[%s2882_s4] ss:$0 sm:$0xff]  ;;  %v2495_v2 = vrot.slane %v2436_v26, %v247_v27  ;;  %vm1770_vm3 = vcmask 23552  }
   0xc   :  { %1992 = vmatpush3.msra.mxu0 %v2337_v10  ;;  %1926 = vmatprep.subr.mxu1 %v2196_v0  ;;  %v248_v29 = vrot.slane %v164_v28, %v247_v27  ;;  %v65_v40 = vld [vmem:[%s2874_s6 + $0x20] sm:$0xff] }
   0xd   :  { %1941 = vmatmul.mubr.msk.f32.gmra.mxu0 %vm87_vm1, %v257_v12  ;;  %1993 = vmatprep.subr.mxu0 %v2196_v0  ;;  %v1788_v47 = vld [vmem:[%s2883_s7] ss:$0 sm:$0xff]  ;;  %s2199_s7 = smov 64  }
   0xe   :  { %1943 = vmatprep.mubr.msk.f32.mxu0 %vm2197_vm0, %v2196_v0  ;;  %1994 = vmatpush3.msra.mxu0 %v2352_v13 }
   0xf   :  { %1995 = vmatprep.subr.mxu0 %v2196_v0  ;;  %1927 = vmatpush3.msra.mxu1 %v62_v15 }
  0x10   :  { %1996 = vmatpush3.msra.mxu0 %v2361_v14  ;;  %1928 = vmatprep.subr.mxu1 %v2196_v0 }
  0x11   :  { %1944 = vmatmul.mubr.msk.f32.gmra.mxu0 %vm87_vm1, %v258_v16  ;;  %1929 = vmatpush3.msra.mxu1 %v61_v17 }
  0x12   :  { %1946 = vmatprep.mubr.msk.f32.mxu0 %vm2197_vm0, %v2196_v0  ;;  %1931 = vmatmul.mubr.msk.f32.vlgmr.msra.gmra.mxu1 %vm171_vm2, %v2388_v19 }
  0x13   :  { %1958 = vmatprep.subr.mxu1 %v2196_v0  ;;  %1968 = vmatprep.mubr.msk.f32.mxu1 %vm2197_vm0, %v2196_v0 }
  0x14   :  { %2000 = vmatprep.subr.mxu0 %v2196_v0 }
  0x15   :  { %1947 = vmatmul.mubr.msk.f32.gmra.mxu0 %vm87_vm1, %v259_v18 }
  0x16   :  { %1949 = vmatprep.mubr.msk.f32.mxu0 %vm2197_vm0, %v2196_v0 }
  0x19   :  { %1950 = vmatmul.mubr.msk.f32.gmra.mxu0 %vm87_vm1, %v260_v20 }
  0x1a   :  { %1952 = vmatprep.mubr.msk.f32.mxu0 %vm2197_vm0, %v2196_v0 }
  0x1d   :  { %1953 = vmatmul.mubr.msk.f32.gmra.mxu0 %vm87_vm1, %v261_v21 }
  0x1e   :  { %1955 = vmatprep.mubr.msk.f32.mxu0 %vm2197_vm0, %v2196_v0 }
  0x21   :  { %1956 = vmatmul.mubr.msk.f32.gmra.mxu0 %vm87_vm1, %v262_v22  ;;  %vm1754_vm1 = vcmask 80896  }
  0x22   :  { %1997 = vmatprep.mubr.msk.f32.mxu0 %vm2197_vm0, %v2196_v0 }
  0x25   :  { %1998 = vmatmul.mubr.msk.f32.vlgmr.msra.gmra.mxu0 %vm171_vm2, %v2388_v19 }
  0x26   :  { %2001 = vmatpush3.msra.mxu0 %v2327_v8  ;;  %2008 = vmatprep.mubr.msk.f32.mxu0 %vm2197_vm0, %v2196_v0 }
  0x27   :  { %2002 = vmatprep.subr.mxu0 %v2196_v0 }
  0x28   :  { %2003 = vmatpush3.msra.mxu0 %v2337_v10 }
  0x29   :  { %2004 = vmatprep.subr.mxu0 %v2196_v0 }
  0x2a   :  { %2005 = vmatpush3.msra.mxu0 %v2352_v13 }
  0x2b   :  { %2006 = vmatprep.subr.mxu0 %v2196_v0 }
  0x2c   :  { %2007 = vmatpush3.msra.mxu0 %v2361_v14 }
  0x2d   :  { %2022 = vmatprep.subr.mxu0 %v2196_v0 }
  0x76   :  { %v405_v39 = vpop.permute.xlu0 %404 }
  0xc5   :  { %v157_v30 = vpop.f32.mrf.mxu0 }
  0xc6   :  { %1959 = vmatpush3.msk.msra.mxu1 %vm454_vm4, %v157_v30  ;;  %vm1756_vm4 = vcmask 121856  }
  0xc7   :  { %v1921_v32 = vpop.f32.mrf.mxu0  ;;  %1960 = vmatprep.subr.mxu1 %v2196_v0 }
  0xc8   :  { %1961 = vmatpush3.msra.mxu1 %v68_v31 }
  0xc9   :  { %v356_v35 = vpop.f32.mrf.mxu0  ;;  %1962 = vmatprep.subr.mxu1 %v2196_v0 }
  0xca   :  { %v357_v37 = vadd.f32 %v1790_v33, %v356_v35  ;;  %1963 = vmatpush3.msra.mxu1 %v67_v34 }
  0xcb   :  { %v1939_v38 = vpop.f32.mrf.mxu0  ;;  %1964 = vmatprep.subr.mxu1 %v2196_v0 }
  0xcc   :  { %v390_v41 = vmax.f32 %v357_v37, 0.0  ;;  %1965 = vmatpush3.msra.mxu1 %v66_v36 }
  0xcd   :  { %1966 = vmatprep.subr.mxu1 %v2196_v0  ;;  %v361_v42 = vpop.f32.mrf.mxu0 }
  0xce   :  { %v425_v43 = vsel %vm171_vm2, %v390_v41, %v405_v39  ;;  %1967 = vmatpush3.msra.mxu1 %v65_v40  ;;  %v2463_v44 = vadd.f32 %v1790_v33, %v361_v42 }
  0xcf   :  { %1969 = vmatmul.mubr.msk.f32.vlgmr.msra.gmra.mxu1 %vm432_vm5, %v425_v43  ;;  %v1942_v45 = vpop.f32.mrf.mxu0  ;;  %2011 = vmatprep.subr.mxu1 %v2196_v0 }
  0xd0   :  { %1971 = vmatprep.mubr.msk.f32.mxu1 %vm2197_vm0, %v2196_v0  ;;  %2012 = vmatpush3.msra.mxu1 %v2327_v8  ;;  %v2540_v45 = vld [vmem:[%s2877_s2 + $0x10] sm:$0xff] }
  0xd1   :  { %v366_v46 = vpop.f32.mrf.mxu0  ;;  %2013 = vmatprep.subr.mxu1 %v2196_v0 }
  0xd2   :  { %v2474_v48 = vadd.f32 %v1790_v33, %v366_v46  ;;  %2014 = vmatpush3.msra.mxu1 %v2337_v10  ;;  %v241_v50 = vpop.f32.mrf.mxu1  ;;  %v2547_v46 = vld [vmem:[%s2877_s2 + $0x20] sm:$0xff] }
  0xd3   :  { %v1945_v49 = vpop.f32.mrf.mxu0  ;;  %2015 = vmatprep.subr.mxu1 %v2196_v0  ;;  %v242_v51 = vadd.f32 %v1788_v47, %v241_v50  ;;  %v2554_v47 = vld [vmem:[%s2877_s2 + $0x30] sm:$0xff] }
  0xd4   :  { %2016 = vmatpush3.msra.mxu1 %v2352_v13  ;;  %v1932_v53 = vpop.f32.mrf.mxu1 }
  0xd5   :  { %v371_v52 = vpop.f32.mrf.mxu0  ;;  %2017 = vmatprep.subr.mxu1 %v2196_v0  ;;  %v2482_v55 = vadd.f32 %v248_v29, %v242_v51 }
  0xd6   :  { %v2480_v54 = vadd.f32 %v1790_v33, %v371_v52  ;;  %2018 = vmatpush3.msra.mxu1 %v2361_v14 }
  0xd7   :  { %v1948_v56 = vpop.f32.mrf.mxu0  ;;  %2033 = vmatprep.subr.mxu1 %v2196_v0 }
  0xd9   :  { %v376_v57 = vpop.f32.mrf.mxu0 }
  0xda   :  { %v2486_v58 = vadd.f32 %v1790_v33, %v376_v57 }
  0xdb   :  { %v1951_v59 = vpop.f32.mrf.mxu0 }
  0xdd   :  { %v381_v60 = vpop.f32.mrf.mxu0 }
  0xde   :  { %v2488_v61 = vadd.f32 %v1790_v33, %v381_v60 }
  0xdf   :  { %v1954_v62 = vpop.f32.mrf.mxu0 }
  0xe0   :  { %v392_v62 = vmax.f32 %v2474_v48, 0.0  ;;  %v2574_v48 = vld [vmem:[%s2877_s2 + $0x28] sm:$0xff] }
  0xe1   :  { %v386_v63 = vpop.f32.mrf.mxu0 }
  0xe2   :  { %v2490_v1 = vadd.f32 %v1790_v33, %v386_v63  ;;  %v391_v33 = vmax.f32 %v2463_v44, 0.0 }
  0xe3   :  { %v1957_v3 = vpop.f32.mrf.mxu0 }
  0xe5   :  { %v674_v4 = vpop.f32.mrf.mxu0 }
  0xe6   :  { %v685_v5 = vadd.f32 %v674_v4, %v2495_v2 }
  0xe7   :  { %v1999_v6 = vpop.f32.mrf.mxu0 }
  0xe8   :  { %687 = vrot.lane.b32.xlu1 %v685_v5, %s2199_s7  ;;  %v2567_v6 = vld [vmem:[%s2877_s2 + $0x18] sm:$0xff] }
 0x15a   :  { %v688_v22 = vpop.permute.xlu1 %687 }
 0x18f   :  { %v524_v7 = vpop.f32.mrf.mxu1 }
 0x190   :  { %v558_v9 = vadd.f32 %v524_v7, %v2482_v55 }
 0x191   :  { %v1970_v11 = vpop.f32.mrf.mxu1 }
 0x192   :  { %566 = vst.msk [vmem:[#allocation2] sm:$0xff] %vm565_vm6, %v558_v9  ;;  %580 = vrot.lane.b32.xlu0 %v558_v9, %s2199_s7 }
 0x196   :  { %699 = vrot.lane.b32.xlu0 %v2388_v19, %s2198_s28  ;;  %v2509_v19 = vld [vmem:[%s2877_s2 + $0x8] sm:$0xff] }
 0x199   :  { %v678_v12 = vld [vmem:[#allocation2] sm:$0xff] }
 0x19a   :  { %v679_v15 = vadd.f32 %v678_v12, %v674_v4 }
 0x19c   :  { %v680_v16 = vmul.f32 0.5, %v679_v15  ;;  %v393_v15 = vmax.f32 %v2480_v54, 0.0  ;;  %v395_v54 = vmax.f32 %v2488_v61, 0.0 }
 0x19e   :  { %2154 = vtanh.f32 %v680_v16 }
 0x1ab   :  { %v2155_v17 = vpop.eup %2154 }
 0x1ac   :  { %v682_v18 = vadd.f32 1.0, %v2155_v17 }
 0x1ae   :  { %v683_v21 = vmul.f32 0.5, %v682_v18 }
 0x1b0   :  { %v690_v23 = vmul.f32 %v688_v22, %v683_v21  ;;  %v693_v29 = vsub.f32 1.0, %v683_v21 }
 0x204   :  { %v581_v20 = vpop.permute.xlu0 %580 }
 0x205   :  { %601 = vst.msk [vmem:[#allocation3] sm:$0xff] %vm171_vm2, %v581_v20 }
 0x208   :  { %v700_v28 = vpop.permute.xlu0 %699 }
 0x209   :  { %v702_v31 = vmul.f32 %v700_v28, %v683_v21  ;;  %v394_v21 = vmax.f32 %v2486_v58, 0.0  ;;  %v396_v58 = vmax.f32 %v2490_v1, 0.0 }
 0x20c   :  { %v684_v24 = vld [vmem:[#allocation3] sm:$0xff] }
 0x20d   :  { %v691_v26 = vadd.f32 %v690_v23, %v684_v24 }
 0x20f   :  { %2156 = vtanh.f32 %v691_v26 }
 0x21c   :  { %v2157_v27 = vpop.eup %2156 }
 0x21d   :  { %695 = vrot.lane.b32.xlu1 %v2157_v27, %s2198_s28 }
 0x221   :  { %406 = vrot.lane.b32.xlu1 %v2509_v19, %s2198_s28 }
 0x28f   :  { %v696_v30 = vpop.permute.xlu1 %695 }
 0x290   :  { %v698_v32 = vmul.f32 %v696_v30, %v693_v29 }
 0x292   :  { %v703_v34 = vadd.f32 %v702_v31, %v698_v32 }
 0x293   :  { %v407_v35 = vpop.permute.xlu1 %406 }
 0x294   :  { %v426_v36 = vsel %vm171_vm2, %v391_v33, %v407_v35  ;;  %705 = vrot.lane.b32.xlu0 %v703_v34, %s2200_s23 }
 0x295   :  { %1972 = vmatmul.mubr.msk.f32.gmra.mxu1 %vm432_vm5, %v426_v36 }
 0x296   :  { %1974 = vmatprep.mubr.msk.f32.mxu1 %vm2197_vm0, %v2196_v0 }
 0x306   :  { %v706_v37 = vpop.permute.xlu0 %705 }
 0x307   :  { %708 = vst.msk [vmem:[#allocation4] sm:$0xff] %vm171_vm2, %v706_v37  ;;  %2009 = vmatmul.mubr.msk.f32.vlgmr.msra.gmra.mxu0 %vm171_vm2, %v706_v37 }
 0x308   :  { %2023 = vmatpush3.msra.mxu0 %v2327_v8  ;;  %2030 = vmatprep.mubr.msk.f32.mxu0 %vm2197_vm0, %v2196_v0 }
 0x309   :  { %2024 = vmatprep.subr.mxu0 %v2196_v0 }
 0x30a   :  { %2025 = vmatpush3.msra.mxu0 %v2337_v10 }
 0x30b   :  { %2026 = vmatprep.subr.mxu0 %v2196_v0 }
 0x30c   :  { %2027 = vmatpush3.msra.mxu0 %v2352_v13 }
 0x30d   :  { %2028 = vmatprep.subr.mxu0 %v2196_v0 }
 0x30e   :  { %2029 = vmatpush3.msra.mxu0 %v2361_v14 }
 0x30f   :  { %2044 = vmatprep.subr.mxu0 %v2196_v0 }
 0x355   :  { %v529_v38 = vpop.f32.mrf.mxu1 }
 0x356   :  { %v559_v39 = vadd.f32 %v529_v38, %v2482_v55 }
 0x357   :  { %v1973_v40 = vpop.f32.mrf.mxu1 }
 0x358   :  { %567 = vst.msk [vmem:[#allocation2 + $0x8] sm:$0xff] %vm565_vm6, %v559_v39  ;;  %582 = vrot.lane.b32.xlu1 %v559_v39, %s2199_s7 }
 0x35f   :  { %v782_v49 = vld [vmem:[#allocation2 + $0x8] sm:$0xff] }
 0x3c7   :  { %v777_v41 = vpop.f32.mrf.mxu0 }
 0x3c8   :  { %v790_v42 = vadd.f32 %v777_v41, %v2495_v2  ;;  %v783_v50 = vadd.f32 %v782_v49, %v777_v41 }
 0x3c9   :  { %v2010_v43 = vpop.f32.mrf.mxu0 }
 0x3ca   :  { %792 = vrot.lane.b32.xlu0 %v790_v42, %s2199_s7  ;;  %v583_v44 = vpop.permute.xlu1 %582  ;;  %v784_v51 = vmul.f32 0.5, %v783_v50 }
 0x3cb   :  { %602 = vst.msk [vmem:[#allocation3 + $0x8] sm:$0xff] %vm171_vm2, %v583_v44 }
 0x3cc   :  { %2158 = vtanh.f32 %v784_v51 }
 0x3ce   :  { %408 = vrot.lane.b32.xlu0 %v2540_v45, %s2198_s28 }
 0x3d2   :  { %412 = vrot.lane.b32.xlu0 %v2547_v46, %s2198_s28  ;;  %v789_v60 = vld [vmem:[#allocation3 + $0x8] sm:$0xff] }
 0x3d6   :  { %416 = vrot.lane.b32.xlu0 %v2554_v47, %s2198_s28 }
 0x3d9   :  { %v2159_v52 = vpop.eup %2158 }
 0x3da   :  { %v786_v53 = vadd.f32 1.0, %v2159_v52 }
 0x3dc   :  { %v787_v56 = vmul.f32 0.5, %v786_v53 }
 0x3de   :  { %v798_v7 = vsub.f32 1.0, %v787_v56  ;;  %v804_v11 = vmul.f32 %v787_v56, %v703_v34 }
 0x43c   :  { %v793_v57 = vpop.permute.xlu0 %792 }
 0x43d   :  { %v795_v59 = vmul.f32 %v793_v57, %v787_v56 }
 0x43f   :  { %v796_v63 = vadd.f32 %v795_v59, %v789_v60 }
 0x440   :  { %v409_v3 = vpop.permute.xlu0 %408 }
 0x441   :  { %2160 = vtanh.f32 %v796_v63  ;;  %v427_v4 = vsel %vm171_vm2, %v392_v62, %v409_v3 }
 0x442   :  { %1975 = vmatmul.mubr.msk.f32.gmra.mxu1 %vm432_vm5, %v427_v4 }
 0x443   :  { %1977 = vmatprep.mubr.msk.f32.mxu1 %vm2197_vm0, %v2196_v0 }
 0x444   :  { %v413_v20 = vpop.permute.xlu0 %412 }
 0x445   :  { %v429_v22 = vsel %vm171_vm2, %v394_v21, %v413_v20 }
 0x448   :  { %v417_v26 = vpop.permute.xlu0 %416 }
 0x449   :  { %v431_v27 = vsel %vm171_vm2, %v396_v58, %v417_v26 }
 0x44e   :  { %v2161_v5 = vpop.eup %2160 }
 0x44f   :  { %800 = vrot.lane.b32.xlu1 %v2161_v5, %s2198_s28 }
 0x453   :  { %410 = vrot.lane.b32.xlu1 %v2567_v6, %s2198_s28 }
 0x457   :  { %414 = vrot.lane.b32.xlu1 %v2574_v48, %s2198_s28 }
 0x4c1   :  { %v801_v9 = vpop.permute.xlu1 %800 }
 0x4c2   :  { %v803_v12 = vmul.f32 %v801_v9, %v798_v7 }
 0x4c4   :  { %v2579_v16 = vadd.f32 %v804_v11, %v803_v12 }
 0x4c5   :  { %v411_v17 = vpop.permute.xlu1 %410 }
 0x4c6   :  { %v428_v18 = vsel %vm171_vm2, %v393_v15, %v411_v17  ;;  %807 = vrot.lane.b32.xlu1 %v2579_v16, %s2200_s23 }
 0x4c7   :  { %1978 = vmatmul.mubr.msk.f32.gmra.mxu1 %vm432_vm5, %v428_v18 }
 0x4c8   :  { %1980 = vmatprep.mubr.msk.f32.mxu1 %vm2197_vm0, %v2196_v0 }
 0x4c9   :  { %v415_v23 = vpop.permute.xlu1 %414 }
 0x4ca   :  { %v430_v24 = vsel %vm171_vm2, %v395_v54, %v415_v23 }
 0x4cb   :  { %1981 = vmatmul.mubr.msk.f32.gmra.mxu1 %vm432_vm5, %v429_v22 }
 0x4cc   :  { %1983 = vmatprep.mubr.msk.f32.mxu1 %vm2197_vm0, %v2196_v0 }
 0x4cf   :  { %1984 = vmatmul.mubr.msk.f32.gmra.mxu1 %vm432_vm5, %v430_v24 }
 0x4d0   :  { %1986 = vmatprep.mubr.msk.f32.mxu1 %vm2197_vm0, %v2196_v0 }
 0x4d3   :  { %1987 = vmatmul.mubr.msk.f32.gmra.mxu1 %vm432_vm5, %v431_v27  ;;  %vm1772_vm5 = vcmask 31744  }
 0x4d4   :  { %2019 = vmatprep.mubr.msk.f32.mxu1 %vm2197_vm0, %v2196_v0 }
 0x502   :  { %v534_v61 = vpop.f32.mrf.mxu1 }
 0x503   :  { %v560_v28 = vadd.f32 %v534_v61, %v2482_v55 }
 0x504   :  { %v1976_v29 = vpop.f32.mrf.mxu1 }
 0x505   :  { %568 = vst.msk [vmem:[#allocation2 + $0x10] sm:$0xff] %vm565_vm6, %v560_v28  ;;  %584 = vrot.lane.b32.xlu0 %v560_v28, %s2199_s7 }
 0x50c   :  { %v885_v50 = vld [vmem:[#allocation2 + $0x10] sm:$0xff] }
 0x538   :  { %v808_v30 = vpop.permute.xlu1 %807 }
 0x539   :  { %811 = vst.msk [vmem:[#allocation4 + $0x8] sm:$0xff] %vm171_vm2, %v808_v30  ;;  %2020 = vmatmul.mubr.msk.f32.vlgmr.msra.gmra.mxu1 %vm171_vm2, %v808_v30 }
 0x53a   :  { %2034 = vmatpush3.msra.mxu1 %v2327_v8  ;;  %2041 = vmatprep.mubr.msk.f32.mxu1 %vm2197_vm0, %v2196_v0 }
 0x53b   :  { %2035 = vmatprep.subr.mxu1 %v2196_v0 }
 0x53c   :  { %2036 = vmatpush3.msra.mxu1 %v2337_v10 }
 0x53d   :  { %2037 = vmatprep.subr.mxu1 %v2196_v0 }
 0x53e   :  { %2038 = vmatpush3.msra.mxu1 %v2352_v13 }
 0x53f   :  { %2039 = vmatprep.subr.mxu1 %v2196_v0 }
 0x540   :  { %2040 = vmatpush3.msra.mxu1 %v2361_v14 }
 0x541   :  { %2055 = vmatprep.subr.mxu1 %v2196_v0 }
 0x577   :  { %v585_v1 = vpop.permute.xlu0 %584 }
 0x578   :  { %603 = vst.msk [vmem:[#allocation3 + $0x10] sm:$0xff] %vm171_vm2, %v585_v1 }
 0x57f   :  { %v892_v60 = vld [vmem:[#allocation3 + $0x10] sm:$0xff] }
 0x587   :  { %v539_v31 = vpop.f32.mrf.mxu1 }
 0x588   :  { %v561_v32 = vadd.f32 %v539_v31, %v2482_v55 }
 0x589   :  { %v1979_v33 = vpop.f32.mrf.mxu1 }
 0x58a   :  { %569 = vst.msk [vmem:[#allocation2 + $0x18] sm:$0xff] %vm565_vm6, %v561_v32 }
 0x58b   :  { %v544_v34 = vpop.f32.mrf.mxu1 }
 0x58c   :  { %v2621_v35 = vadd.f32 %v544_v34, %v2482_v55 }
 0x58d   :  { %v1982_v36 = vpop.f32.mrf.mxu1 }
 0x58e   :  { %570 = vst.msk [vmem:[#allocation2 + $0x20] sm:$0xff] %vm565_vm6, %v2621_v35 }
 0x58f   :  { %v549_v37 = vpop.f32.mrf.mxu1 }
 0x590   :  { %v2626_v38 = vadd.f32 %v549_v37, %v2482_v55 }
 0x591   :  { %v1985_v39 = vpop.f32.mrf.mxu1  ;;  %v988_v18 = vld [vmem:[#allocation2 + $0x18] sm:$0xff] }
 0x592   :  { %571 = vst.msk [vmem:[#allocation2 + $0x28] sm:$0xff] %vm565_vm6, %v2626_v38 }
 0x593   :  { %v554_v40 = vpop.f32.mrf.mxu1 }
 0x594   :  { %v2631_v41 = vadd.f32 %v554_v40, %v2482_v55 }
 0x595   :  { %v1988_v42 = vpop.f32.mrf.mxu1  ;;  %v1091_v36 = vld [vmem:[#allocation2 + $0x20] sm:$0xff] }
 0x596   :  { %572 = vst.msk [vmem:[#allocation2 + $0x30] sm:$0xff] %vm565_vm6, %v2631_v41  ;;  %vm1758_vm6 = vcmask 162816  }
 0x5f9   :  { %v880_v43 = vpop.f32.mrf.mxu1 }
 0x5fa   :  { %v893_v44 = vadd.f32 %v880_v43, %v2495_v2  ;;  %v886_v51 = vadd.f32 %v885_v50, %v880_v43 }
 0x5fb   :  { %v2021_v49 = vpop.f32.mrf.mxu1 }
 0x5fc   :  { %895 = vrot.lane.b32.xlu1 %v893_v44, %s2199_s7  ;;  %v887_v52 = vmul.f32 0.5, %v886_v51 }
 0x5fe   :  { %2162 = vtanh.f32 %v887_v52 }
 0x60b   :  { %v2163_v53 = vpop.eup %2162 }
 0x60c   :  { %v889_v56 = vadd.f32 1.0, %v2163_v53 }
 0x60e   :  { %v890_v57 = vmul.f32 0.5, %v889_v56 }
 0x610   :  { %v901_v3 = vsub.f32 1.0, %v890_v57  ;;  %v907_v5 = vmul.f32 %v890_v57, %v2579_v16 }
 0x66e   :  { %v896_v59 = vpop.permute.xlu1 %895 }
 0x66f   :  { %v898_v55 = vmul.f32 %v896_v59, %v890_v57  ;;  %v80_v59 = vld [vmem:[%s2884_s10 + $0x18] sm:$0xff] }
 0x671   :  { %v899_v62 = vadd.f32 %v898_v55, %v892_v60  ;;  %v78_v60 = vld [vmem:[%s2884_s10 + $0x8] sm:$0xff] }
 0x673   :  { %2164 = vtanh.f32 %v899_v62  ;;  %v77_v62 = vld [vmem:[%s2884_s10] sm:$0xff] }
 0x680   :  { %v2165_v63 = vpop.eup %2164 }
 0x681   :  { %903 = vrot.lane.b32.xlu0 %v2165_v63, %s2198_s28  ;;  %v1327_v63 = vld [vmem:[#allocation4] sm:$0xff] }
 0x685   :  { %586 = vrot.lane.b32.xlu0 %v561_v32, %s2199_s7 }
 0x6f3   :  { %v904_v4 = vpop.permute.xlu0 %903 }
 0x6f4   :  { %v906_v7 = vmul.f32 %v904_v4, %v901_v3  ;;  %v1328_v3 = vld [vmem:[#allocation4 + $0x8] sm:$0xff] }
 0x6f6   :  { %v908_v9 = vadd.f32 %v907_v5, %v906_v7 }
 0x6f7   :  { %v587_v11 = vpop.permute.xlu0 %586 }
 0x6f8   :  { %604 = vst.msk [vmem:[#allocation3 + $0x18] sm:$0xff] %vm171_vm2, %v587_v11  ;;  %910 = vrot.lane.b32.xlu1 %v908_v9, %s2200_s23 }
 0x6ff   :  { %v995_v58 = vld [vmem:[#allocation3 + $0x18] sm:$0xff] }
 0x76a   :  { %v911_v12 = vpop.permute.xlu1 %910 }
 0x76b   :  { %914 = vst.msk [vmem:[#allocation4 + $0x10] sm:$0xff] %vm171_vm2, %v911_v12  ;;  %2031 = vmatmul.mubr.msk.f32.vlgmr.msra.gmra.mxu0 %vm171_vm2, %v911_v12 }
 0x76c   :  { %2045 = vmatpush3.msra.mxu0 %v2327_v8  ;;  %2052 = vmatprep.mubr.msk.f32.mxu0 %vm2197_vm0, %v2196_v0 }
 0x76d   :  { %2046 = vmatprep.subr.mxu0 %v2196_v0 }
 0x76e   :  { %2047 = vmatpush3.msra.mxu0 %v2337_v10 }
 0x76f   :  { %2048 = vmatprep.subr.mxu0 %v2196_v0 }
 0x770   :  { %2049 = vmatpush3.msra.mxu0 %v2352_v13 }
 0x771   :  { %2050 = vmatprep.subr.mxu0 %v2196_v0 }
 0x772   :  { %2051 = vmatpush3.msra.mxu0 %v2361_v14  ;;  %v1329_v4 = vld [vmem:[#allocation4 + $0x10] sm:$0xff] }
 0x773   :  { %2066 = vmatprep.subr.mxu0 %v2196_v0 }
 0x82b   :  { %v983_v15 = vpop.f32.mrf.mxu0 }
 0x82c   :  { %v996_v16 = vadd.f32 %v983_v15, %v2495_v2  ;;  %v989_v20 = vadd.f32 %v988_v18, %v983_v15 }
 0x82d   :  { %v2032_v17 = vpop.f32.mrf.mxu0 }
 0x82e   :  { %998 = vrot.lane.b32.xlu1 %v996_v16, %s2199_s7  ;;  %v990_v21 = vmul.f32 0.5, %v989_v20 }
 0x830   :  { %2166 = vtanh.f32 %v990_v21 }
 0x83d   :  { %v2167_v22 = vpop.eup %2166 }
 0x83e   :  { %v992_v23 = vadd.f32 1.0, %v2167_v22 }
 0x840   :  { %v993_v54 = vmul.f32 0.5, %v992_v23 }
 0x842   :  { %v1004_v28 = vsub.f32 1.0, %v993_v54  ;;  %v1010_v30 = vmul.f32 %v993_v54, %v908_v9 }
 0x8a0   :  { %v999_v24 = vpop.permute.xlu1 %998 }
 0x8a1   :  { %v1001_v26 = vmul.f32 %v999_v24, %v993_v54 }
 0x8a3   :  { %v1002_v27 = vadd.f32 %v1001_v26, %v995_v58  ;;  %v1194_v26 = vld [vmem:[#allocation2 + $0x28] sm:$0xff] }
 0x8a5   :  { %2168 = vtanh.f32 %v1002_v27 }
 0x8b2   :  { %v2169_v61 = vpop.eup %2168 }
 0x8b3   :  { %1006 = vrot.lane.b32.xlu0 %v2169_v61, %s2198_s28 }
 0x8b7   :  { %588 = vrot.lane.b32.xlu0 %v2621_v35, %s2199_s7 }
 0x925   :  { %v1007_v29 = vpop.permute.xlu0 %1006 }
 0x926   :  { %v1009_v1 = vmul.f32 %v1007_v29, %v1004_v28 }
 0x928   :  { %v1011_v31 = vadd.f32 %v1010_v30, %v1009_v1 }
 0x929   :  { %v589_v32 = vpop.permute.xlu0 %588 }
 0x92a   :  { %605 = vst.msk [vmem:[#allocation3 + $0x20] sm:$0xff] %vm171_vm2, %v589_v32  ;;  %1013 = vrot.lane.b32.xlu1 %v1011_v31, %s2200_s23 }
 0x931   :  { %v1098_v44 = vld [vmem:[#allocation3 + $0x20] sm:$0xff] }
 0x99c   :  { %v1014_v33 = vpop.permute.xlu1 %1013 }
 0x99d   :  { %1017 = vst.msk [vmem:[#allocation4 + $0x18] sm:$0xff] %vm171_vm2, %v1014_v33  ;;  %2042 = vmatmul.mubr.msk.f32.vlgmr.msra.gmra.mxu1 %vm171_vm2, %v1014_v33 }
 0x99e   :  { %2056 = vmatpush3.msra.mxu1 %v2327_v8  ;;  %2063 = vmatprep.mubr.msk.f32.mxu1 %vm2197_vm0, %v2196_v0 }
 0x99f   :  { %2057 = vmatprep.subr.mxu1 %v2196_v0 }
 0x9a0   :  { %2058 = vmatpush3.msra.mxu1 %v2337_v10 }
 0x9a1   :  { %2059 = vmatprep.subr.mxu1 %v2196_v0 }
 0x9a2   :  { %2060 = vmatpush3.msra.mxu1 %v2352_v13 }
 0x9a3   :  { %2061 = vmatprep.subr.mxu1 %v2196_v0 }
 0x9a4   :  { %2062 = vmatpush3.msra.mxu1 %v2361_v14  ;;  %v1330_v5 = vld [vmem:[#allocation4 + $0x18] sm:$0xff] }
 0x9a5   :  { %2095 = vmatprep.subr.mxu1 %v2196_v0 }
 0xa5d   :  { %v1086_v34 = vpop.f32.mrf.mxu1 }
 0xa5e   :  { %v1099_v8 = vadd.f32 %v1086_v34, %v2495_v2  ;;  %v1092_v37 = vadd.f32 %v1091_v36, %v1086_v34 }
 0xa5f   :  { %v2043_v35 = vpop.f32.mrf.mxu1 }
 0xa60   :  { %1101 = vrot.lane.b32.xlu1 %v1099_v8, %s2199_s7  ;;  %v1093_v39 = vmul.f32 0.5, %v1092_v37 }
 0xa62   :  { %2170 = vtanh.f32 %v1093_v39 }
 0xa6f   :  { %v2171_v10 = vpop.eup %2170 }
 0xa70   :  { %v1095_v40 = vadd.f32 1.0, %v2171_v10  ;;  %v2731_v10 = vld [vmem:[%s2885_s11] ss:$0 sm:$0xff] }
 0xa72   :  { %v1096_v42 = vmul.f32 0.5, %v1095_v40 }
 0xa74   :  { %v1107_v50 = vsub.f32 1.0, %v1096_v42  ;;  %v1113_v52 = vmul.f32 %v1096_v42, %v1011_v31 }
 0xad2   :  { %v1102_v13 = vpop.permute.xlu1 %1101 }
 0xad3   :  { %v1104_v43 = vmul.f32 %v1102_v13, %v1096_v42  ;;  %v85_v13 = vld [vmem:[%s2886_s12 + $0x18] sm:$0xff] }
 0xad5   :  { %v1105_v49 = vadd.f32 %v1104_v43, %v1098_v44  ;;  %v84_v44 = vld [vmem:[%s2886_s12 + $0x10] sm:$0xff] }
 0xad7   :  { %2172 = vtanh.f32 %v1105_v49 }
 0xae4   :  { %v2173_v14 = vpop.eup %2172 }
 0xae5   :  { %1109 = vrot.lane.b32.xlu0 %v2173_v14, %s2198_s28  ;;  %v83_v14 = vld [vmem:[%s2886_s12 + $0x8] sm:$0xff] }
 0xae9   :  { %590 = vrot.lane.b32.xlu0 %v2626_v38, %s2199_s7  ;;  %v79_v38 = vld [vmem:[%s2884_s10 + $0x10] sm:$0xff] }
 0xb57   :  { %v1110_v51 = vpop.permute.xlu0 %1109 }
 0xb58   :  { %v1112_v53 = vmul.f32 %v1110_v51, %v1107_v50  ;;  %v82_v50 = vld [vmem:[%s2886_s12] sm:$0xff]  ;;  %s2202_s12 = smov 124  }
 0xb5a   :  { %v2678_v56 = vadd.f32 %v1113_v52, %v1112_v53 }
 0xb5b   :  { %v591_v57 = vpop.permute.xlu0 %590 }
 0xb5c   :  { %606 = vst.msk [vmem:[#allocation3 + $0x28] sm:$0xff] %vm171_vm2, %v591_v57  ;;  %1116 = vrot.lane.b32.xlu1 %v2678_v56, %s2200_s23 }
 0xb63   :  { %v1201_v31 = vld [vmem:[#allocation3 + $0x28] sm:$0xff] }
 0xbce   :  { %v1117_v55 = vpop.permute.xlu1 %1116 }
 0xbcf   :  { %1120 = vst.msk [vmem:[#allocation4 + $0x20] sm:$0xff] %vm171_vm2, %v1117_v55  ;;  %2053 = vmatmul.mubr.msk.f32.vlgmr.msra.gmra.mxu0 %vm171_vm2, %v1117_v55 }
 0xbd0   :  { %2067 = vmatpush3.msra.mxu0 %v80_v59  ;;  %2074 = vmatprep.mubr.msk.f32.mxu0 %vm2197_vm0, %v2196_v0 }
 0xbd1   :  { %2068 = vmatprep.subr.mxu0 %v2196_v0 }
 0xbd2   :  { %2069 = vmatpush3.msra.mxu0 %v79_v38 }
 0xbd3   :  { %2070 = vmatprep.subr.mxu0 %v2196_v0 }
 0xbd4   :  { %2071 = vmatpush3.msra.mxu0 %v78_v60 }
 0xbd5   :  { %2072 = vmatprep.subr.mxu0 %v2196_v0 }
 0xbd6   :  { %2073 = vmatpush3.msra.mxu0 %v77_v62  ;;  %v1331_v7 = vld [vmem:[#allocation4 + $0x20] sm:$0xff] }
 0xbd7   :  { %2075 = vmatmul.mubr.msk.f32.vlgmr.msra.gmra.mxu0 %vm171_vm2, %v1327_v63 }
 0xbd8   :  { %2077 = vmatprep.mubr.msk.f32.mxu0 %vm2197_vm0, %v2196_v0 }
 0xbdb   :  { %2078 = vmatmul.mubr.msk.f32.gmra.mxu0 %vm171_vm2, %v1328_v3 }
 0xbdc   :  { %2080 = vmatprep.mubr.msk.f32.mxu0 %vm2197_vm0, %v2196_v0 }
 0xbdf   :  { %2081 = vmatmul.mubr.msk.f32.gmra.mxu0 %vm171_vm2, %v1329_v4 }
 0xbe0   :  { %2083 = vmatprep.mubr.msk.f32.mxu0 %vm2197_vm0, %v2196_v0 }
 0xbe3   :  { %2084 = vmatmul.mubr.msk.f32.gmra.mxu0 %vm171_vm2, %v1330_v5 }
 0xbe4   :  { %2086 = vmatprep.mubr.msk.f32.mxu0 %vm2197_vm0, %v2196_v0 }
 0xbe7   :  { %2087 = vmatmul.mubr.msk.f32.gmra.mxu0 %vm171_vm2, %v1331_v7 }
 0xbe8   :  { %2089 = vmatprep.mubr.msk.f32.mxu0 %vm2197_vm0, %v2196_v0 }
 0xc8f   :  { %v1189_v9 = vpop.f32.mrf.mxu0 }
 0xc90   :  { %v1202_v11 = vadd.f32 %v1189_v9, %v2495_v2  ;;  %v1195_v58 = vadd.f32 %v1194_v26, %v1189_v9 }
 0xc91   :  { %v2054_v12 = vpop.f32.mrf.mxu0 }
 0xc92   :  { %1204 = vrot.lane.b32.xlu1 %v1202_v11, %s2199_s7  ;;  %v1196_v27 = vmul.f32 0.5, %v1195_v58 }
 0xc94   :  { %2174 = vtanh.f32 %v1196_v27 }
 0xc97   :  { %v1427_v15 = vpop.f32.mrf.mxu0 }
 0xc99   :  { %v2076_v16 = vpop.f32.mrf.mxu0 }
 0xc9b   :  { %v1432_v17 = vpop.f32.mrf.mxu0 }
 0xc9c   :  { %v1433_v40 = vadd.f32 %v2731_v10, %v1432_v17 }
 0xc9d   :  { %v2079_v18 = vpop.f32.mrf.mxu0 }
 0xc9f   :  { %v1437_v20 = vpop.f32.mrf.mxu0 }
 0xca0   :  { %v1438_v42 = vadd.f32 %v2731_v10, %v1437_v20 }
 0xca1   :  { %v2082_v21 = vpop.f32.mrf.mxu0  ;;  %v2175_v61 = vpop.eup %2174 }
 0xca2   :  { %v1198_v28 = vadd.f32 1.0, %v2175_v61  ;;  %v1297_v21 = vld [vmem:[#allocation2 + $0x30] sm:$0xff] }
 0xca3   :  { %v1442_v22 = vpop.f32.mrf.mxu0 }
 0xca4   :  { %v1199_v29 = vmul.f32 0.5, %v1198_v28  ;;  %v1443_v49 = vadd.f32 %v2731_v10, %v1442_v22 }
 0xca5   :  { %v2085_v23 = vpop.f32.mrf.mxu0 }
 0xca6   :  { %v1210_v34 = vsub.f32 1.0, %v1199_v29  ;;  %v1216_v35 = vmul.f32 %v1199_v29, %v2678_v56 }
 0xca7   :  { %v1447_v54 = vpop.f32.mrf.mxu0 }
 0xca8   :  { %v1448_v51 = vadd.f32 %v2731_v10, %v1447_v54 }
 0xca9   :  { %v2088_v24 = vpop.f32.mrf.mxu0 }
 0xd04   :  { %v1205_v30 = vpop.permute.xlu1 %1204 }
 0xd05   :  { %v1207_v1 = vmul.f32 %v1205_v30, %v1199_v29  ;;  %v2201_v29 = vmov 0   ;;  %v1595_v30 = vmax.f32 %v2509_v19, 0.0 }
 0xd06   :  { %2152 = vset.pattern.permute.xlu0 %v2201_v29  ;;  %2153 = vset.pattern.permute.xlu1 %v2201_v29 }
 0xd07   :  { %v1208_v32 = vadd.f32 %v1207_v1, %v1201_v31  ;;  %v1596_v1 = vmax.f32 %v1595_v30, %v2540_v45 }
 0xd09   :  { %2176 = vtanh.f32 %v1208_v32  ;;  %v1597_v31 = vmax.f32 %v1596_v1, %v2567_v6 }
 0xd0b   :  { %v1598_v32 = vmax.f32 %v1597_v31, %v2547_v46 }
 0xd16   :  { %v2177_v33 = vpop.eup %2176 }
 0xd17   :  { %1212 = vrot.lane.b32.xlu0 %v2177_v33, %s2198_s28  ;;  %v1599_v33 = vmax.f32 %v1598_v32, %v2574_v48 }
 0xd19   :  { %v1600_v46 = vmax.f32 %v1599_v33, %v2554_v47 }
 0xd1b   :  { %592 = vrot.lane.b32.xlu0 %v2631_v41, %s2199_s7  ;;  %v1428_v41 = vadd.f32 %v2731_v10, %v1427_v15 }
 0xd1d   :  { %2178 = vtanh.f32 %v1428_v41 }
 0xd1e   :  { %2180 = vtanh.f32 %v1433_v40 }
 0xd1f   :  { %2182 = vtanh.f32 %v1438_v42 }
 0xd20   :  { %2184 = vtanh.f32 %v1443_v49 }
 0xd21   :  { %2186 = vtanh.f32 %v1448_v51 }
 0xd2a   :  { %v2179_v52 = vpop.eup %2178 }
 0xd2b   :  { %v2181_v56 = vpop.eup %2180 }
 0xd2c   :  { %v2183_v57 = vpop.eup %2182 }
 0xd2d   :  { %v2185_v59 = vpop.eup %2184 }
 0xd2e   :  { %v2187_v55 = vpop.eup %2186 }
 0xd89   :  { %v1213_v8 = vpop.permute.xlu0 %1212 }
 0xd8a   :  { %v1215_v36 = vmul.f32 %v1213_v8, %v1210_v34 }
 0xd8c   :  { %v2723_v37 = vadd.f32 %v1216_v35, %v1215_v36 }
 0xd8d   :  { %v593_v39 = vpop.permute.xlu0 %592 }
 0xd8e   :  { %607 = vst.msk [vmem:[#allocation3 + $0x30] sm:$0xff] %vm171_vm2, %v593_v39  ;;  %1219 = vrot.lane.b32.xlu1 %v2723_v37, %s2200_s23 }
 0xd95   :  { %v1304_v61 = vld [vmem:[#allocation3 + $0x30] sm:$0xff] }
 0xe00   :  { %v1220_v43 = vpop.permute.xlu1 %1219 }
 0xe01   :  { %1223 = vst.msk [vmem:[#allocation4 + $0x28] sm:$0xff] %vm171_vm2, %v1220_v43  ;;  %2064 = vmatmul.mubr.msk.f32.vlgmr.msra.gmra.mxu1 %vm171_vm2, %v1220_v43 }
 0xe02   :  { %2096 = vmatpush3.msra.mxu1 %v85_v13  ;;  %2103 = vmatprep.mubr.msk.f32.mxu1 %vm2197_vm0, %v2196_v0 }
 0xe03   :  { %2097 = vmatprep.subr.mxu1 %v2196_v0 }
 0xe04   :  { %2098 = vmatpush3.msra.mxu1 %v84_v44  ;;  %v2203_v44 = vmov -1e+30  }
 0xe05   :  { %2099 = vmatprep.subr.mxu1 %v2196_v0  ;;  %v2803_v49 = vsel %vm1619_vm7, 0.0, %v2203_v44  ;;  %vm1775_vm7 = vcmask 48128  }
 0xe06   :  { %2100 = vmatpush3.msra.mxu1 %v83_v14 }
 0xe07   :  { %2101 = vmatprep.subr.mxu1 %v2196_v0 }
 0xe08   :  { %2102 = vmatpush3.msra.mxu1 %v82_v50  ;;  %v1332_v53 = vld [vmem:[#allocation4 + $0x28] sm:$0xff]  ;;  %v2809_v50 = vld [vmem:[%s2887_s13] ss:$0 sm:$0xff]  ;;  %s2204_s13 = smov 10  }
 0xe09   :  { %2104 = vmatmul.mubr.msk.f32.vlgmr.msra.gmra.mxu1 %vm171_vm2, %v2179_v52  ;;  %2090 = vmatmul.mubr.msk.f32.gmra.mxu0 %vm171_vm2, %v1332_v53 }
 0xe0a   :  { %2106 = vmatprep.mubr.msk.f32.mxu1 %vm2197_vm0, %v2196_v0  ;;  %2092 = vmatprep.mubr.msk.f32.mxu0 %vm2197_vm0, %v2196_v0 }
 0xe0d   :  { %2107 = vmatmul.mubr.msk.f32.gmra.mxu1 %vm171_vm2, %v2181_v56  ;;  %v1650_v56 = vmul.f32 0.0, %v2803_v49 }
 0xe0e   :  { %2109 = vmatprep.mubr.msk.f32.mxu1 %vm2197_vm0, %v2196_v0 }
 0xe11   :  { %2110 = vmatmul.mubr.msk.f32.gmra.mxu1 %vm171_vm2, %v2183_v57 }
 0xe12   :  { %2112 = vmatprep.mubr.msk.f32.mxu1 %vm2197_vm0, %v2196_v0 }
 0xe15   :  { %2113 = vmatmul.mubr.msk.f32.gmra.mxu1 %vm171_vm2, %v2185_v59 }
 0xe16   :  { %2115 = vmatprep.mubr.msk.f32.mxu1 %vm2197_vm0, %v2196_v0 }
 0xe19   :  { %2116 = vmatmul.mubr.msk.f32.gmra.mxu1 %vm171_vm2, %v2187_v55 }
 0xe1a   :  { %2118 = vmatprep.mubr.msk.f32.mxu1 %vm2197_vm0, %v2196_v0 }
 0xec1   :  { %v1292_v38 = vpop.f32.mrf.mxu1 }
 0xec2   :  { %v1305_v60 = vadd.f32 %v1292_v38, %v2495_v2  ;;  %v1298_v22 = vadd.f32 %v1297_v21, %v1292_v38 }
 0xec3   :  { %v2065_v62 = vpop.f32.mrf.mxu1 }
 0xec4   :  { %1307 = vrot.lane.b32.xlu1 %v1305_v60, %s2199_s7  ;;  %v1299_v23 = vmul.f32 0.5, %v1298_v22 }
 0xec9   :  { %v2777_v63 = vpop.f32.mrf.mxu1  ;;  %v1452_v3 = vpop.f32.mrf.mxu0 }
 0xeca   :  { %v1453_v4 = vadd.f32 %v2731_v10, %v1452_v3  ;;  %v2820_v53 = vadd.f32 %v2809_v50, %v2777_v63 }
 0xecb   :  { %v2105_v5 = vpop.f32.mrf.mxu1  ;;  %v2091_v7 = vpop.f32.mrf.mxu0 }
 0xecc   :  { %2188 = vtanh.f32 %v1453_v4  ;;  %v1657_v59 = vadd.f32 %v1650_v56, %v2820_v53 }
 0xecd   :  { %v2780_v9 = vpop.f32.mrf.mxu1  ;;  %2190 = vtanh.f32 %v1299_v23 }
 0xece   :  { %v2813_v51 = vadd.f32 %v2809_v50, %v2780_v9  ;;  %v1666_v55 = vsel %vm1665_vm8, %v1657_v59, -inf }
 0xecf   :  { %v2108_v11 = vpop.f32.mrf.mxu1 }
 0xed1   :  { %v2782_v12 = vpop.f32.mrf.mxu1 }
 0xed2   :  { %v1572_v60 = vadd.f32 %v2809_v50, %v2782_v12 }
 0xed3   :  { %v2111_v15 = vpop.f32.mrf.mxu1 }
 0xed5   :  { %v2784_v16 = vpop.f32.mrf.mxu1 }
 0xed6   :  { %v1577_v11 = vadd.f32 %v2809_v50, %v2784_v16 }
 0xed7   :  { %v2114_v2 = vpop.f32.mrf.mxu1 }
 0xed9   :  { %v2189_v17 = vpop.eup %2188  ;;  %v2786_v18 = vpop.f32.mrf.mxu1 }
 0xeda   :  { %2119 = vmatmul.mubr.msk.f32.gmra.mxu1 %vm171_vm2, %v2189_v17  ;;  %v2191_v54 = vpop.eup %2190  ;;  %v2832_v4 = vadd.f32 %v2809_v50, %v2786_v18 }
 0xedb   :  { %v2117_v20 = vpop.f32.mrf.mxu1  ;;  %2121 = vmatprep.mubr.msk.f32.mxu1 %vm2197_vm0, %v2196_v0  ;;  %v1301_v24 = vadd.f32 1.0, %v2191_v54  ;;  %v1664_v54 = vcvt.s32.f32 %v2431_v25  ;;  %vm1766_vm0 = vcmask 7168  }
 0xedd   :  { %v1302_v26 = vmul.f32 0.5, %v1301_v24 }
 0xedf   :  { %v1313_v35 = vsub.f32 1.0, %v1302_v26  ;;  %v1319_v19 = vmul.f32 %v1302_v26, %v2723_v37 }
 0xf36   :  { %v1308_v58 = vpop.permute.xlu1 %1307 }
 0xf37   :  { %v1310_v27 = vmul.f32 %v1308_v58, %v1302_v26 }
 0xf39   :  { %v1311_v28 = vadd.f32 %v1310_v27, %v1304_v61 }
 0xf3b   :  { %2192 = vtanh.f32 %v1311_v28 }
 0xf48   :  { %v2193_v0 = vpop.eup %2192 }
 0xf49   :  { %1315 = vrot.lane.b32.xlu0 %v2193_v0, %s2198_s28 }
 0xf4d   :  { %1602 = vrot.lane.b32.xlu0 %v1595_v30, %s2202_s12 }
 0xf51   :  { %1608 = vrot.lane.b32.xlu0 %v1597_v31, %s2202_s12 }
 0xf55   :  { %1614 = vrot.lane.b32.xlu0 %v1599_v33, %s2202_s12 }
 0xf9a   :  { %v1586_v34 = vpop.f32.mrf.mxu1 }
 0xf9b   :  { %v2842_v18 = vadd.f32 %v2809_v50, %v1586_v34 }
 0xf9c   :  { %v2120_v8 = vpop.f32.mrf.mxu1 }
 0xfbb   :  { %v1316_v36 = vpop.permute.xlu0 %1315 }
 0xfbc   :  { %v1318_v45 = vmul.f32 %v1316_v36, %v1313_v35 }
 0xfbe   :  { %v1320_v39 = vadd.f32 %v1319_v19, %v1318_v45 }
 0xfbf   :  { %v1603_v41 = vpop.permute.xlu0 %1602 }
 0xfc0   :  { %1322 = vrot.lane.b32.xlu1 %v1320_v39, %s2200_s23  ;;  %1627 = vperm.xlu0 %2152, %v1603_v41   ;;  %s2205_s23 = smov 15  }
 0xfc3   :  { %v1609_v40 = vpop.permute.xlu0 %1608 }
 0xfc4   :  { %1605 = vrot.lane.b32.xlu1 %v1596_v1, %s2202_s12 }
 0xfc7   :  { %v1615_v43 = vpop.permute.xlu0 %1614 }
 0xfc8   :  { %1611 = vrot.lane.b32.xlu1 %v1598_v32, %s2202_s12 }
 0xfcc   :  { %1617 = vrot.lane.b32.xlu1 %v1600_v46, %s2202_s12 }
0x1032   :  { %v1323_v6 = vpop.permute.xlu1 %1322 }
0x1033   :  { %1326 = vst.msk [vmem:[#allocation4 + $0x30] sm:$0xff] %vm171_vm2, %v1323_v6 }
0x1036   :  { %v1606_v48 = vpop.permute.xlu1 %1605 }
0x1037   :  { %1631 = vperm.xlu1 %2153, %v1606_v48  }
0x103a   :  { %v1612_v42 = vpop.permute.xlu1 %1611  ;;  %v1333_v13 = vld [vmem:[#allocation4 + $0x30] sm:$0xff] }
0x103b   :  { %2093 = vmatmul.mubr.msk.f32.gmra.mxu0 %vm171_vm2, %v1333_v13  ;;  %1639 = vperm.xlu0 %2152, %v1612_v42   ;;  %v1628_v47 = vpop.permute.xlu0 %1627 }
0x103c   :  { %1635 = vperm.xlu1 %2153, %v1609_v40   ;;  %v1651_v14 = vmul.f32 %v1628_v47, %v2803_v49 }
0x103e   :  { %v1618_v37 = vpop.permute.xlu1 %1617  ;;  %v2816_v52 = vadd.f32 %v1651_v14, %v2813_v51 }
0x103f   :  { %1647 = vperm.xlu0 %2152, %v1618_v37  }
0x1040   :  { %1643 = vperm.xlu1 %2153, %v1615_v43   ;;  %v1669_v57 = vsel %vm1665_vm8, %v2816_v52, -inf }
0x105e   :  { %1670 = vmax.xlane.f32.xlu0 %v1669_v57 }
0x1064   :  { %1667 = vmax.xlane.f32.xlu1 %v1666_v55 }
0x10b2   :  { %v1632_v38 = vpop.permute.xlu1 %1631 }
0x10b3   :  { %v1652_v62 = vmul.f32 %v1632_v38, %v2803_v49 }
0x10b5   :  { %v1659_v63 = vadd.f32 %v1652_v62, %v1572_v60 }
0x10b6   :  { %v1640_v3 = vpop.permute.xlu0 %1639 }
0x10b7   :  { %v1636_v5 = vpop.permute.xlu1 %1635  ;;  %v1654_v7 = vmul.f32 %v1640_v3, %v2803_v49  ;;  %v1672_v9 = vsel %vm1665_vm8, %v1659_v63, -inf }
0x10b8   :  { %v1653_v15 = vmul.f32 %v1636_v5, %v2803_v49  ;;  %1673 = vmax.xlane.f32.xlu0 %v1672_v9 }
0x10b9   :  { %v1661_v12 = vadd.f32 %v1654_v7, %v2832_v4 }
0x10ba   :  { %v1660_v2 = vadd.f32 %v1653_v15, %v1577_v11  ;;  %v1648_v30 = vpop.permute.xlu0 %1647 }
0x10bb   :  { %v1644_v17 = vpop.permute.xlu1 %1643  ;;  %v1678_v20 = vsel %vm1665_vm8, %v1661_v12, -inf  ;;  %v1656_v8 = vmul.f32 %v1648_v30, %v2803_v49 }
0x10bc   :  { %v1655_v21 = vmul.f32 %v1644_v17, %v2803_v49  ;;  %v1675_v22 = vsel %vm1665_vm8, %v1660_v2, -inf  ;;  %1679 = vmax.xlane.f32.xlu0 %v1678_v20 }
0x10bd   :  { %1676 = vmax.xlane.f32.xlu1 %v1675_v22 }
0x10be   :  { %v1662_v16 = vadd.f32 %v1655_v21, %v2842_v18 }
0x10c0   :  { %v1681_v23 = vsel %vm1665_vm8, %v1662_v16, -inf }
0x10c1   :  { %1682 = vmax.xlane.f32.xlu1 %v1681_v23 }
0x10e7   :  { %v1671_v1 = vpop.xlane.xlu0 %1670 }
0x10e8   :  { %vm1688_vm12 = vcmp.eq.f32.partialorder %v2816_v52, %v1671_v1 }
0x10e9   :  { %v1695_v41 = vsel %vm1688_vm12, %v1664_v54, 5.0  ;;  %vm1764_vm12 = vcmask 285696  }
0x10ea   :  { %v1704_v6 = vsel %vm1665_vm8, %v1695_v41, inf }
0x10ed   :  { %v1668_v24 = vpop.xlane.xlu1 %1667 }
0x10ee   :  { %vm1687_vm9 = vcmp.eq.f32.partialorder %v1657_v59, %v1668_v24 }
0x10ef   :  { %v1694_v26 = vsel %vm1687_vm9, %v1664_v54, 5.0  ;;  %vm1760_vm9 = vcmask 203776  }
0x10f0   :  { %v1701_v58 = vsel %vm1665_vm8, %v1694_v26, inf }
0x10f1   :  { %1702 = vmin.xlane.f32.xlu1 %v1701_v58 }
0x10fb   :  { %v1457_v27 = vpop.f32.mrf.mxu0 }
0x10fc   :  { %v1458_v61 = vadd.f32 %v2731_v10, %v1457_v27 }
0x10fd   :  { %v2094_v28 = vpop.f32.mrf.mxu0 }
0x10fe   :  { %2194 = vtanh.f32 %v1458_v61 }
0x110b   :  { %v2195_v29 = vpop.eup %2194 }
0x110c   :  { %2122 = vmatmul.mubr.msk.f32.gmra.mxu1 %vm171_vm2, %v2195_v29  ;;  %vm1768_vm2 = vcmask 15360  }
0x1141   :  { %v1674_v0 = vpop.xlane.xlu0 %1673 }
0x1142   :  { %vm1689_vm10 = vcmp.eq.f32.partialorder %v1659_v63, %v1674_v0 }
0x1143   :  { %v1696_v31 = vsel %vm1689_vm10, %v1664_v54, 5.0  ;;  %vm1777_vm10 = vcmask 56320  }
0x1144   :  { %v1707_v25 = vsel %vm1665_vm8, %v1696_v31, inf }
0x1145   :  { %v1680_v32 = vpop.xlane.xlu0 %1679  ;;  %1708 = vmin.xlane.f32.xlu1 %v1707_v25 }
0x1146   :  { %vm1691_vm11 = vcmp.eq.f32.partialorder %v1661_v12, %v1680_v32  ;;  %v1677_v36 = vpop.xlane.xlu1 %1676 }
0x1147   :  { %v1698_v33 = vsel %vm1691_vm11, %v1664_v54, 5.0  ;;  %vm1690_vm13 = vcmp.eq.f32.partialorder %v1660_v2, %v1677_v36  ;;  %vm1762_vm11 = vcmask 244736  }
0x1148   :  { %v1713_v34 = vsel %vm1665_vm8, %v1698_v33, inf  ;;  %v1697_v48 = vsel %vm1690_vm13, %v1664_v54, 5.0 }
0x1149   :  { %1714 = vmin.xlane.f32.xlu1 %v1713_v34  ;;  %v1710_v40 = vsel %vm1665_vm8, %v1697_v48, inf }
0x114a   :  { %v1683_v46 = vpop.xlane.xlu1 %1682 }
0x114b   :  { %vm1692_vm14 = vcmp.eq.f32.partialorder %v1662_v16, %v1683_v46 }
0x114c   :  { %v1699_v42 = vsel %vm1692_vm14, %v1664_v54, 5.0 }
0x114d   :  { %v1716_v13 = vsel %vm1665_vm8, %v1699_v42, inf }
0x115a   :  { %1734 = vrot.lane.b32.xlu1 %v1572_v60, %s2204_s13 }
0x115e   :  { %1738 = vrot.lane.b32.xlu1 %v1577_v11, %s2205_s23 }
0x117a   :  { %v1703_v44 = vpop.xlane.xlu1 %1702 }
0x117b   :  { %v2124_v57 = vtrunc.f32 %v1703_v44 }
0x117d   :  { %v2125_v63 = vcvt.f32.s32 %v2124_v57 }
0x11cc   :  { %v1591_v10 = vpop.f32.mrf.mxu1 }
0x11cd   :  { %v1592_v35 = vadd.f32 %v2809_v50, %v1591_v10 }
0x11ce   :  { %v2123_v19 = vpop.f32.mrf.mxu1  ;;  %v1709_v14 = vpop.xlane.xlu1 %1708 }
0x11cf   :  { %v1663_v45 = vadd.f32 %v1656_v8, %v1592_v35  ;;  %v2128_v62 = vtrunc.f32 %v1709_v14 }
0x11d1   :  { %v1684_v39 = vsel %vm1665_vm8, %v1663_v45, -inf  ;;  %v2129_v11 = vcvt.f32.s32 %v2128_v62 }
0x11d2   :  { %1685 = vmax.xlane.f32.xlu0 %v1684_v39  ;;  %v1715_v52 = vpop.xlane.xlu1 %1714 }
0x11d3   :  { %v2132_v15 = vtrunc.f32 %v1715_v52 }
0x11d5   :  { %v2133_v22 = vcvt.f32.s32 %v2132_v15 }
0x11d6   :  { %1705 = vmin.xlane.f32.xlu0 %v1704_v6  ;;  %v1735_v59 = vpop.permute.xlu1 %1734 }
0x11da   :  { %1711 = vmin.xlane.f32.xlu0 %v1710_v40 }
0x11de   :  { %1717 = vmin.xlane.f32.xlu0 %v1716_v13 }
0x11f4   :  { %1730 = vrot.lane.b32.xlu0 %v2813_v51, %s2206_s27 }
0x11f8   :  { %1742 = vrot.lane.b32.xlu0 %v2832_v4, %s2207_s1  ;;  %v1739_v4 = vpop.permute.xlu1 %1738 }
0x11fc   :  { %1750 = vrot.lane.b32.xlu0 %v1592_v35, %s2208_s5 }
0x125b   :  { %v1686_v37 = vpop.xlane.xlu0 %1685 }
0x125c   :  { %vm1693_vm15 = vcmp.eq.f32.partialorder %v1663_v45, %v1686_v37 }
0x125d   :  { %v1700_v43 = vsel %vm1693_vm15, %v1664_v54, 5.0 }
0x125e   :  { %v1719_v47 = vsel %vm1665_vm8, %v1700_v43, inf }
0x125f   :  { %1720 = vmin.xlane.f32.xlu1 %v1719_v47  ;;  %v1706_v49 = vpop.xlane.xlu0 %1705 }
0x1260   :  { %v2126_v56 = vtrunc.f32 %v1706_v49 }
0x1262   :  { %v2127_v55 = vcvt.f32.s32 %v2126_v56 }
0x1263   :  { %v1712_v50 = vpop.xlane.xlu0 %1711 }
0x1264   :  { %v2130_v38 = vtrunc.f32 %v1712_v50  ;;  %v1767_v5 = vsel %vm1766_vm0, %v2125_v63, %v2127_v55 }
0x1265   :  { %v1769_v2 = vsel %vm1768_vm2, %v1767_v5, %v2129_v11 }
0x1266   :  { %v2131_v7 = vcvt.f32.s32 %v2130_v38 }
0x1267   :  { %v1718_v51 = vpop.xlane.xlu0 %1717 }
0x1268   :  { %v2134_v9 = vtrunc.f32 %v1718_v51  ;;  %v1771_v20 = vsel %vm1770_vm3, %v1769_v2, %v2131_v7 }
0x1269   :  { %v1773_v23 = vsel %vm1772_vm5, %v1771_v20, %v2133_v22 }
0x126b   :  { %v1731_v60 = vpop.permute.xlu0 %1730 }
0x126c   :  { %v1753_v3 = vsel %vm1665_vm8, %v2820_v53, %v1731_v60 }
0x126d   :  { %v1755_v12 = vsel %vm1754_vm1, %v1753_v3, %v1735_v59 }
0x126e   :  { %v1757_v16 = vsel %vm1756_vm4, %v1755_v12, %v1739_v4 }
0x126f   :  { %v1743_v17 = vpop.permute.xlu0 %1742 }
0x1270   :  { %1746 = vrot.lane.b32.xlu1 %v2842_v18, %s2209_s29  ;;  %v2135_v18 = vcvt.f32.s32 %v2134_v9  ;;  %v1759_v26 = vsel %vm1758_vm6, %v1757_v16, %v1743_v17 }
0x1272   :  { %v1774_v24 = vsel %vm1665_vm8, %v1773_v23, %v2135_v18 }
0x1273   :  { %v1751_v27 = vpop.permute.xlu0 %1750 }
0x12e8   :  { %v1721_v21 = vpop.xlane.xlu1 %1720 }
0x12e9   :  { %v2136_v53 = vtrunc.f32 %v1721_v21 }
0x12eb   :  { %v2137_v54 = vcvt.f32.s32 %v2136_v53 }
0x12ec   :  { %v1747_v58 = vpop.permute.xlu1 %1746 }
0x12ed   :  { %v1776_v61 = vsel %vm1775_vm7, %v1774_v24, %v2137_v54  ;;  %v1761_v28 = vsel %vm1760_vm9, %v1759_v26, %v1747_v58 }
0x12ee   :  { %1778 = vst.msk [vmem:[%s2888_s14] sm:$0xff] %vm1777_vm10, %v1776_v61  ;;  %v1763_v29 = vsel %vm1762_vm11, %v1761_v28, %v1751_v27 }
0x12ef   :  { %1765 = vst.msk [vmem:[%s2889_s15] sm:$0xff] %vm1764_vm12, %v1763_v29 }

</bundles_post_ra>
